<compile_context>
chip_gen: v7x
topology: tpu7x:2x2x1
jax: 0.10.0
libtpu: 0.0.40
codegen_flags: <defaults>
</compile_context>

<pallas_src>
import functools

import jax
import jax.numpy as jnp
import numpy as np
from jax.experimental import pallas as pl
from jax.experimental.pallas import tpu as pltpu


# --------------------------------------------------------------------------
# In-kernel helpers
# --------------------------------------------------------------------------
def _mm(x_f32, w_bf16):
    """bf16 operands on the MXU, f32 accumulation."""
    return jnp.dot(x_f32.astype(jnp.bfloat16), w_bf16,
                   preferred_element_type=jnp.float32)


def _layernorm(x, g, b, eps=1e-5):
    m = jnp.mean(x, axis=-1, keepdims=True)
    v = jnp.mean((x - m) ** 2, axis=-1, keepdims=True)
    return (x - m) * jax.lax.rsqrt(v + eps) * g + b


# --------------------------------------------------------------------------
# Single fused kernel: encoder -> transformer (post-norm, seq_len==1) -> decoder
# --------------------------------------------------------------------------
def _apollo_kernel(
    x_ref,
    enc_w1, enc_w2,                 # bf16 weights
    wv, wo, w1, w2,                 # bf16 stacked per-layer weights
    dec_w1, dec_w2, dec_w3,         # bf16 weights
    ed_bias,                        # (8, input_size) f32: enc_b1, enc_b2, dec_b1, dec_b2, dec_b3
    layer_slab,                     # (L, 8, 4H) f32: bv, bo, b1, b2, ln1_g, ln1_b, ln2_g, ln2_b
    o_ref,
    *, num_layers, hidden,
):
    H = hidden
    x = x_ref[...]
    ed = ed_bias[...]

    # ---- encoder: Linear+ReLU (+Dropout=id), Linear+ReLU (+Dropout=id) ----
    h = jnp.maximum(_mm(x, enc_w1[...]) + ed[0:1, :H], 0.0)
    h = jnp.maximum(_mm(h, enc_w2[...]) + ed[1:2, :H], 0.0)

    # ---- transformer encoder layers (post-norm). seq_len == 1 so the
    #      softmax over a single key is exactly 1 and ctx == v.           ----
    for i in range(num_layers):
        s = layer_slab[i]                         # (8, 4H) f32
        bv, bo = s[0:1, :H], s[1:2, :H]
        b1, b2 = s[2:3, :], s[3:4, :H]
        ln1_g, ln1_b = s[4:5, :H], s[5:6, :H]
        ln2_g, ln2_b = s[6:7, :H], s[7:8, :H]

        v = _mm(h, wv[i]) + bv
        attn = _mm(v, wo[i]) + bo
        h = _layernorm(h + attn, ln1_g, ln1_b)
        ff = jnp.maximum(_mm(h, w1[i]) + b1, 0.0)  # (+Dropout=id)
        ff = _mm(ff, w2[i]) + b2
        h = _layernorm(h + ff, ln2_g, ln2_b)

    # ---- decoder ----
    d = jnp.maximum(_mm(h, dec_w1[...]) + ed[2:3, :H // 2], 0.0)
    d = jnp.maximum(_mm(d, dec_w2[...]) + ed[3:4, :H // 4], 0.0)
    d = jnp.tanh(_mm(d, dec_w3[...]) + ed[4:5, :])
    o_ref[...] = d.astype(o_ref.dtype)


def forward(params, x):
    B = x.shape[0]
    x = x.reshape(B, -1)
    L, H = params["wv"].shape[0], params["wv"].shape[1]
    input_size = params["dec_w3"].shape[1]

    kernel = functools.partial(_apollo_kernel, num_layers=L, hidden=H)

    operands = (
        x,
        params["enc_w1"], params["enc_w2"],
        params["wv"], params["wo"], params["w1"], params["w2"],
        params["dec_w1"], params["dec_w2"], params["dec_w3"],
        params["ed_bias"], params["layer_slab"],
    )

    # Roofline hint: this kernel is HBM + launch bound, not MXU/VPU bound.
    flops = 2 * B * (
        input_size * H + H * H
        + L * (H * H + H * H + H * 4 * H + 4 * H * H)
        + H * (H // 2) + (H // 2) * (H // 4) + (H // 4) * input_size
    )
    bytes_accessed = int(
        sum(int(np.prod(a.shape)) * a.dtype.itemsize for a in operands)
        + B * input_size * x.dtype.itemsize
    )
    transcendentals = int(B * input_size + 2 * L * B)

    # No grid / no BlockSpecs: every operand (weights ~1.3 MiB bf16, biases
    # ~100 KiB f32, activations a few KiB) lives whole in VMEM, giving one
    # launch and one lane-dense (B, input_size) output store.
    # (For large serving batches: add a 1-D grid over batch tiles with
    #  constant-index weight BlockSpecs so the weight DMA is amortized.)
    return pl.pallas_call(
        kernel,
        out_shape=jax.ShapeDtypeStruct((B, input_size), x.dtype),
        compiler_params=pltpu.CompilerParams(vmem_limit_bytes=32 << 20),
        cost_estimate=pl.CostEstimate(
            flops=int(flops),
            transcendentals=transcendentals,
            bytes_accessed=bytes_accessed,
        ),
    )(*operands)


# --------------------------------------------------------------------------
# Parameters (mirrors SimpleApolloModel in eval mode).
# Weights: bf16.  Biases / LayerNorm params: packed f32 slabs.
# --------------------------------------------------------------------------
def init_params(key, input_size, hidden, num_layers):
    H = hidden

    def lin(key, fan_in, fan_out):
        kw, kb = jax.random.split(key)
        w = jax.random.normal(kw, (fan_in, fan_out), jnp.float32) / np.sqrt(fan_in)
        b = jax.random.normal(kb, (fan_out,), jnp.float32) * 0.01
        return w.astype(jnp.bfloat16), np.asarray(b)

    keys = jax.random.split(key, 5 + num_layers)
    p = {}
    p["enc_w1"], enc_b1 = lin(keys[0], input_size, H)
    p["enc_w2"], enc_b2 = lin(keys[1], H, H)
    p["dec_w1"], dec_b1 = lin(keys[2], H, H // 2)
    p["dec_w2"], dec_b2 = lin(keys[3], H // 2, H // 4)
    p["dec_w3"], dec_b3 = lin(keys[4], H // 4, input_size)

    # Encoder/decoder bias slab: one (8, input_size) f32 operand.
    ed = np.zeros((8, input_size), np.float32)
    ed[0, :H] = enc_b1
    ed[1, :H] = enc_b2
    ed[2, :H // 2] = dec_b1
    ed[3, :H // 4] = dec_b2
    ed[4, :] = dec_b3
    p["ed_bias"] = jnp.asarray(ed)

    # Per-layer slab: (L, 8, 4H) f32 rows = bv, bo, b1, b2, ln1_g, ln1_b, ln2_g, ln2_b.
    wv, wo, w1, w2 = [], [], [], []
    slab = np.zeros((num_layers, 8, 4 * H), np.float32)
    for i in range(num_layers):
        lk = jax.random.split(keys[5 + i], 4)
        a, c = lin(lk[0], H, H); wv.append(a); slab[i, 0, :H] = c
        a, c = lin(lk[1], H, H); wo.append(a); slab[i, 1, :H] = c
        a, c = lin(lk[2], H, 4 * H); w1.append(a); slab[i, 2, :] = c
        a, c = lin(lk[3], 4 * H, H); w2.append(a); slab[i, 3, :H] = c
        slab[i, 4, :H] = 1.0   # ln1 gamma
        slab[i, 6, :H] = 1.0   # ln2 gamma (betas stay zero)
    p["wv"], p["wo"] = jnp.stack(wv), jnp.stack(wo)
    p["w1"], p["w2"] = jnp.stack(w1), jnp.stack(w2)
    p["layer_slab"] = jnp.asarray(slab)
    return p


# --------------------------------------------------------------------------
# Pure-JAX reference (same bf16-weight / f32-accumulate numerics as the kernel)
# --------------------------------------------------------------------------
def forward_ref(params, x):
    H = params["wv"].shape[1]
    L = params["wv"].shape[0]
    ed = params["ed_bias"]
    slab = params["layer_slab"]

    def mm(a, w):
        return jnp.dot(a.astype(jnp.bfloat16), w,
                       preferred_element_type=jnp.float32)

    def ln(x, g, b, eps=1e-5):
        m = jnp.mean(x, -1, keepdims=True)
        v = jnp.mean((x - m) ** 2, -1, keepdims=True)
        return (x - m) * jax.lax.rsqrt(v + eps) * g + b

    B = x.shape[0]
    x = x.reshape(B, -1)
    h = jax.nn.relu(mm(x, params["enc_w1"]) + ed[0:1, :H])
    h = jax.nn.relu(mm(h, params["enc_w2"]) + ed[1:2, :H])
    for i in range(L):
        s = slab[i]
        v = mm(h, params["wv"][i]) + s[0:1, :H]          # softmax over 1 key == 1
        attn = mm(v, params["wo"][i]) + s[1:2, :H]
        h = ln(h + attn, s[4:5, :H], s[5:6, :H])
        ff = jax.nn.relu(mm(h, params["w1"][i]) + s[2:3, :])
        ff = mm(ff, params["w2"][i]) + s[3:4, :H]
        h = ln(h + ff, s[6:7, :H], s[7:8, :H])
    d = jax.nn.relu(mm(h, params["dec_w1"]) + ed[2:3, :H // 2])
    d = jax.nn.relu(mm(d, params["dec_w2"]) + ed[3:4, :H // 4])
    return jnp.tanh(mm(d, params["dec_w3"]) + ed[4:5, :])


if __name__ == "__main__":
    # Small, module-consistent shapes: batch=8, input_size=2048, hidden=128,
    # num_layers=2, nhead=8 (nhead only affects the degenerate seq_len==1 attn).
    batch, input_size, hidden, num_layers = 8, 2048, 128, 2

    key = jax.random.PRNGKey(0)
    kp, kx = jax.random.split(key)
    params = init_params(kp, input_size, hidden, num_layers)
    x = jax.random.normal(kx, (batch, input_size), jnp.float32)

    out = jax.block_until_ready(jax.jit(forward)(params, x))
    assert out.shape == (batch, input_size), out.shape

    ref = forward_ref(params, x)
    np.testing.assert_allclose(np.asarray(out), np.asarray(ref),
                               rtol=5e-3, atol=5e-3)
    print("KERNEL_OK")
</pallas_src>

<mosaic_0001>
module attributes {stable_mosaic.version = 11 : i64} {
  func.func @_apollo_kernel(%arg0: memref<8x2048xf32, #tpu.memory_space<vmem>>, %arg1: memref<2048x128xbf16, #tpu.memory_space<vmem>>, %arg2: memref<128x128xbf16, #tpu.memory_space<vmem>>, %arg3: memref<2x128x128xbf16, #tpu.memory_space<vmem>>, %arg4: memref<2x128x128xbf16, #tpu.memory_space<vmem>>, %arg5: memref<2x128x512xbf16, #tpu.memory_space<vmem>>, %arg6: memref<2x512x128xbf16, #tpu.memory_space<vmem>>, %arg7: memref<128x64xbf16, #tpu.memory_space<vmem>>, %arg8: memref<64x32xbf16, #tpu.memory_space<vmem>>, %arg9: memref<32x2048xbf16, #tpu.memory_space<vmem>>, %arg10: memref<8x2048xf32, #tpu.memory_space<vmem>>, %arg11: memref<2x8x512xf32, #tpu.memory_space<vmem>>, %arg12: memref<8x2048xf32, #tpu.memory_space<vmem>>) attributes {dimension_semantics = [], scalar_prefetch = 0 : i64, scratch_operands = 0 : i64, tpu.core_type = #tpu.core_type<tc>} {
    %c0 = arith.constant 0 : index
    %c0_0 = arith.constant 0 : index
    %0 = vector.load %arg0[%c0, %c0_0] : memref<8x2048xf32, #tpu.memory_space<vmem>>, vector<8x2048xf32>
    %c0_1 = arith.constant 0 : index
    %c0_2 = arith.constant 0 : index
    %1 = vector.load %arg10[%c0_1, %c0_2] : memref<8x2048xf32, #tpu.memory_space<vmem>>, vector<8x2048xf32>
    %c0_3 = arith.constant 0 : index
    %c0_4 = arith.constant 0 : index
    %2 = vector.load %arg1[%c0_3, %c0_4] : memref<2048x128xbf16, #tpu.memory_space<vmem>>, vector<2048x128xbf16>
    %3 = arith.truncf %0 : vector<8x2048xf32> to vector<8x2048xbf16>
    %cst = arith.constant dense<0.000000e+00> : vector<8x128xf32>
    %4 = tpu.matmul %3, %2, %cst {dimension_numbers = #tpu.dot_dimension_numbers<[1], [0], [0], [1], [0, 0, 1, 1], [], []>} : vector<8x2048xbf16>, vector<2048x128xbf16>, vector<8x128xf32> -> vector<8x128xf32>
    %5 = vector.extract_strided_slice %1 {offsets = [0, 0], sizes = [1, 128], strides = [1, 1]} : vector<8x2048xf32> to vector<1x128xf32>
    %6 = vector.broadcast %5 : vector<1x128xf32> to vector<8x128xf32>
    %7 = arith.addf %4, %6 : vector<8x128xf32>
    %cst_5 = arith.constant 0.000000e+00 : f32
    %8 = vector.broadcast %cst_5 : f32 to vector<8x128xf32>
    %9 = arith.maximumf %7, %8 : vector<8x128xf32>
    %c0_6 = arith.constant 0 : index
    %c0_7 = arith.constant 0 : index
    %10 = vector.load %arg2[%c0_6, %c0_7] : memref<128x128xbf16, #tpu.memory_space<vmem>>, vector<128x128xbf16>
    %11 = arith.truncf %9 : vector<8x128xf32> to vector<8x128xbf16>
    %cst_8 = arith.constant dense<0.000000e+00> : vector<8x128xf32>
    %12 = tpu.matmul %11, %10, %cst_8 {dimension_numbers = #tpu.dot_dimension_numbers<[1], [0], [0], [1], [0, 0, 1, 1], [], []>} : vector<8x128xbf16>, vector<128x128xbf16>, vector<8x128xf32> -> vector<8x128xf32>
    %13 = vector.extract_strided_slice %1 {offsets = [1, 0], sizes = [1, 128], strides = [1, 1]} : vector<8x2048xf32> to vector<1x128xf32>
    %14 = vector.broadcast %13 : vector<1x128xf32> to vector<8x128xf32>
    %15 = arith.addf %12, %14 : vector<8x128xf32>
    %cst_9 = arith.constant 0.000000e+00 : f32
    %16 = vector.broadcast %cst_9 : f32 to vector<8x128xf32>
    %17 = arith.maximumf %15, %16 : vector<8x128xf32>
    %c0_10 = arith.constant 0 : index
    %c0_11 = arith.constant 0 : index
    %c0_12 = arith.constant 0 : index
    %18 = vector.load %arg11[%c0_10, %c0_11, %c0_12] : memref<2x8x512xf32, #tpu.memory_space<vmem>>, vector<1x8x512xf32>
    %19 = vector.shape_cast %18 : vector<1x8x512xf32> to vector<8x512xf32>
    %20 = vector.extract_strided_slice %19 {offsets = [0, 0], sizes = [1, 128], strides = [1, 1]} : vector<8x512xf32> to vector<1x128xf32>
    %21 = vector.extract_strided_slice %19 {offsets = [1, 0], sizes = [1, 128], strides = [1, 1]} : vector<8x512xf32> to vector<1x128xf32>
    %22 = vector.extract_strided_slice %19 {offsets = [2, 0], sizes = [1, 512], strides = [1, 1]} : vector<8x512xf32> to vector<1x512xf32>
    %23 = vector.extract_strided_slice %19 {offsets = [3, 0], sizes = [1, 128], strides = [1, 1]} : vector<8x512xf32> to vector<1x128xf32>
    %24 = vector.extract_strided_slice %19 {offsets = [4, 0], sizes = [1, 128], strides = [1, 1]} : vector<8x512xf32> to vector<1x128xf32>
    %25 = vector.extract_strided_slice %19 {offsets = [5, 0], sizes = [1, 128], strides = [1, 1]} : vector<8x512xf32> to vector<1x128xf32>
    %26 = vector.extract_strided_slice %19 {offsets = [6, 0], sizes = [1, 128], strides = [1, 1]} : vector<8x512xf32> to vector<1x128xf32>
    %27 = vector.extract_strided_slice %19 {offsets = [7, 0], sizes = [1, 128], strides = [1, 1]} : vector<8x512xf32> to vector<1x128xf32>
    %c0_13 = arith.constant 0 : index
    %c0_14 = arith.constant 0 : index
    %c0_15 = arith.constant 0 : index
    %28 = vector.load %arg3[%c0_13, %c0_14, %c0_15] : memref<2x128x128xbf16, #tpu.memory_space<vmem>>, vector<1x128x128xbf16>
    %29 = vector.shape_cast %28 : vector<1x128x128xbf16> to vector<128x128xbf16>
    %30 = arith.truncf %17 : vector<8x128xf32> to vector<8x128xbf16>
    %cst_16 = arith.constant dense<0.000000e+00> : vector<8x128xf32>
    %31 = tpu.matmul %30, %29, %cst_16 {dimension_numbers = #tpu.dot_dimension_numbers<[1], [0], [0], [1], [0, 0, 1, 1], [], []>} : vector<8x128xbf16>, vector<128x128xbf16>, vector<8x128xf32> -> vector<8x128xf32>
    %32 = vector.broadcast %20 : vector<1x128xf32> to vector<8x128xf32>
    %33 = arith.addf %31, %32 : vector<8x128xf32>
    %c0_17 = arith.constant 0 : index
    %c0_18 = arith.constant 0 : index
    %c0_19 = arith.constant 0 : index
    %34 = vector.load %arg4[%c0_17, %c0_18, %c0_19] : memref<2x128x128xbf16, #tpu.memory_space<vmem>>, vector<1x128x128xbf16>
    %35 = vector.shape_cast %34 : vector<1x128x128xbf16> to vector<128x128xbf16>
    %36 = arith.truncf %33 : vector<8x128xf32> to vector<8x128xbf16>
    %cst_20 = arith.constant dense<0.000000e+00> : vector<8x128xf32>
    %37 = tpu.matmul %36, %35, %cst_20 {dimension_numbers = #tpu.dot_dimension_numbers<[1], [0], [0], [1], [0, 0, 1, 1], [], []>} : vector<8x128xbf16>, vector<128x128xbf16>, vector<8x128xf32> -> vector<8x128xf32>
    %38 = vector.broadcast %21 : vector<1x128xf32> to vector<8x128xf32>
    %39 = arith.addf %37, %38 : vector<8x128xf32>
    %40 = arith.addf %17, %39 : vector<8x128xf32>
    %cst_21 = arith.constant dense<0.000000e+00> : vector<8xf32>
    %41 = vector.multi_reduction <add>, %40, %cst_21 [1] : vector<8x128xf32> to vector<8xf32>
    %42 = vector.shape_cast %41 : vector<8xf32> to vector<8x1xf32>
    %cst_22 = arith.constant 1.280000e+02 : f32
    %43 = vector.broadcast %cst_22 : f32 to vector<8x1xf32>
    %44 = arith.divf %42, %43 : vector<8x1xf32>
    %45 = vector.broadcast %44 : vector<8x1xf32> to vector<8x128xf32>
    %46 = arith.subf %40, %45 : vector<8x128xf32>
    %47 = arith.mulf %46, %46 : vector<8x128xf32>
    %cst_23 = arith.constant dense<0.000000e+00> : vector<8xf32>
    %48 = vector.multi_reduction <add>, %47, %cst_23 [1] : vector<8x128xf32> to vector<8xf32>
    %49 = vector.shape_cast %48 : vector<8xf32> to vector<8x1xf32>
    %cst_24 = arith.constant 1.280000e+02 : f32
    %50 = vector.broadcast %cst_24 : f32 to vector<8x1xf32>
    %51 = arith.divf %49, %50 : vector<8x1xf32>
    %52 = vector.broadcast %44 : vector<8x1xf32> to vector<8x128xf32>
    %53 = arith.subf %40, %52 : vector<8x128xf32>
    %cst_25 = arith.constant 9.99999974E-6 : f32
    %54 = vector.broadcast %cst_25 : f32 to vector<8x1xf32>
    %55 = arith.addf %51, %54 : vector<8x1xf32>
    %56 = math.rsqrt %55 : vector<8x1xf32>
    %57 = vector.broadcast %56 : vector<8x1xf32> to vector<8x128xf32>
    %58 = arith.mulf %53, %57 : vector<8x128xf32>
    %59 = vector.broadcast %24 : vector<1x128xf32> to vector<8x128xf32>
    %60 = arith.mulf %58, %59 : vector<8x128xf32>
    %61 = vector.broadcast %25 : vector<1x128xf32> to vector<8x128xf32>
    %62 = arith.addf %60, %61 : vector<8x128xf32>
    %c0_26 = arith.constant 0 : index
    %c0_27 = arith.constant 0 : index
    %c0_28 = arith.constant 0 : index
    %63 = vector.load %arg5[%c0_26, %c0_27, %c0_28] : memref<2x128x512xbf16, #tpu.memory_space<vmem>>, vector<1x128x512xbf16>
    %64 = vector.shape_cast %63 : vector<1x128x512xbf16> to vector<128x512xbf16>
    %65 = arith.truncf %62 : vector<8x128xf32> to vector<8x128xbf16>
    %cst_29 = arith.constant dense<0.000000e+00> : vector<8x512xf32>
    %66 = tpu.matmul %65, %64, %cst_29 {dimension_numbers = #tpu.dot_dimension_numbers<[1], [0], [0], [1], [0, 0, 1, 1], [], []>} : vector<8x128xbf16>, vector<128x512xbf16>, vector<8x512xf32> -> vector<8x512xf32>
    %67 = vector.broadcast %22 : vector<1x512xf32> to vector<8x512xf32>
    %68 = arith.addf %66, %67 : vector<8x512xf32>
    %cst_30 = arith.constant 0.000000e+00 : f32
    %69 = vector.broadcast %cst_30 : f32 to vector<8x512xf32>
    %70 = arith.maximumf %68, %69 : vector<8x512xf32>
    %c0_31 = arith.constant 0 : index
    %c0_32 = arith.constant 0 : index
    %c0_33 = arith.constant 0 : index
    %71 = vector.load %arg6[%c0_31, %c0_32, %c0_33] : memref<2x512x128xbf16, #tpu.memory_space<vmem>>, vector<1x512x128xbf16>
    %72 = vector.shape_cast %71 : vector<1x512x128xbf16> to vector<512x128xbf16>
    %73 = arith.truncf %70 : vector<8x512xf32> to vector<8x512xbf16>
    %cst_34 = arith.constant dense<0.000000e+00> : vector<8x128xf32>
    %74 = tpu.matmul %73, %72, %cst_34 {dimension_numbers = #tpu.dot_dimension_numbers<[1], [0], [0], [1], [0, 0, 1, 1], [], []>} : vector<8x512xbf16>, vector<512x128xbf16>, vector<8x128xf32> -> vector<8x128xf32>
    %75 = vector.broadcast %23 : vector<1x128xf32> to vector<8x128xf32>
    %76 = arith.addf %74, %75 : vector<8x128xf32>
    %77 = arith.addf %62, %76 : vector<8x128xf32>
    %cst_35 = arith.constant dense<0.000000e+00> : vector<8xf32>
    %78 = vector.multi_reduction <add>, %77, %cst_35 [1] : vector<8x128xf32> to vector<8xf32>
    %79 = vector.shape_cast %78 : vector<8xf32> to vector<8x1xf32>
    %cst_36 = arith.constant 1.280000e+02 : f32
    %80 = vector.broadcast %cst_36 : f32 to vector<8x1xf32>
    %81 = arith.divf %79, %80 : vector<8x1xf32>
    %82 = vector.broadcast %81 : vector<8x1xf32> to vector<8x128xf32>
    %83 = arith.subf %77, %82 : vector<8x128xf32>
    %84 = arith.mulf %83, %83 : vector<8x128xf32>
    %cst_37 = arith.constant dense<0.000000e+00> : vector<8xf32>
    %85 = vector.multi_reduction <add>, %84, %cst_37 [1] : vector<8x128xf32> to vector<8xf32>
    %86 = vector.shape_cast %85 : vector<8xf32> to vector<8x1xf32>
    %cst_38 = arith.constant 1.280000e+02 : f32
    %87 = vector.broadcast %cst_38 : f32 to vector<8x1xf32>
    %88 = arith.divf %86, %87 : vector<8x1xf32>
    %89 = vector.broadcast %81 : vector<8x1xf32> to vector<8x128xf32>
    %90 = arith.subf %77, %89 : vector<8x128xf32>
    %cst_39 = arith.constant 9.99999974E-6 : f32
    %91 = vector.broadcast %cst_39 : f32 to vector<8x1xf32>
    %92 = arith.addf %88, %91 : vector<8x1xf32>
    %93 = math.rsqrt %92 : vector<8x1xf32>
    %94 = vector.broadcast %93 : vector<8x1xf32> to vector<8x128xf32>
    %95 = arith.mulf %90, %94 : vector<8x128xf32>
    %96 = vector.broadcast %26 : vector<1x128xf32> to vector<8x128xf32>
    %97 = arith.mulf %95, %96 : vector<8x128xf32>
    %98 = vector.broadcast %27 : vector<1x128xf32> to vector<8x128xf32>
    %99 = arith.addf %97, %98 : vector<8x128xf32>
    %c1 = arith.constant 1 : index
    %c0_40 = arith.constant 0 : index
    %c0_41 = arith.constant 0 : index
    %100 = vector.load %arg11[%c1, %c0_40, %c0_41] : memref<2x8x512xf32, #tpu.memory_space<vmem>>, vector<1x8x512xf32>
    %101 = vector.shape_cast %100 : vector<1x8x512xf32> to vector<8x512xf32>
    %102 = vector.extract_strided_slice %101 {offsets = [0, 0], sizes = [1, 128], strides = [1, 1]} : vector<8x512xf32> to vector<1x128xf32>
    %103 = vector.extract_strided_slice %101 {offsets = [1, 0], sizes = [1, 128], strides = [1, 1]} : vector<8x512xf32> to vector<1x128xf32>
    %104 = vector.extract_strided_slice %101 {offsets = [2, 0], sizes = [1, 512], strides = [1, 1]} : vector<8x512xf32> to vector<1x512xf32>
    %105 = vector.extract_strided_slice %101 {offsets = [3, 0], sizes = [1, 128], strides = [1, 1]} : vector<8x512xf32> to vector<1x128xf32>
    %106 = vector.extract_strided_slice %101 {offsets = [4, 0], sizes = [1, 128], strides = [1, 1]} : vector<8x512xf32> to vector<1x128xf32>
    %107 = vector.extract_strided_slice %101 {offsets = [5, 0], sizes = [1, 128], strides = [1, 1]} : vector<8x512xf32> to vector<1x128xf32>
    %108 = vector.extract_strided_slice %101 {offsets = [6, 0], sizes = [1, 128], strides = [1, 1]} : vector<8x512xf32> to vector<1x128xf32>
    %109 = vector.extract_strided_slice %101 {offsets = [7, 0], sizes = [1, 128], strides = [1, 1]} : vector<8x512xf32> to vector<1x128xf32>
    %c1_42 = arith.constant 1 : index
    %c0_43 = arith.constant 0 : index
    %c0_44 = arith.constant 0 : index
    %110 = vector.load %arg3[%c1_42, %c0_43, %c0_44] : memref<2x128x128xbf16, #tpu.memory_space<vmem>>, vector<1x128x128xbf16>
    %111 = vector.shape_cast %110 : vector<1x128x128xbf16> to vector<128x128xbf16>
    %112 = arith.truncf %99 : vector<8x128xf32> to vector<8x128xbf16>
    %cst_45 = arith.constant dense<0.000000e+00> : vector<8x128xf32>
    %113 = tpu.matmul %112, %111, %cst_45 {dimension_numbers = #tpu.dot_dimension_numbers<[1], [0], [0], [1], [0, 0, 1, 1], [], []>} : vector<8x128xbf16>, vector<128x128xbf16>, vector<8x128xf32> -> vector<8x128xf32>
    %114 = vector.broadcast %102 : vector<1x128xf32> to vector<8x128xf32>
    %115 = arith.addf %113, %114 : vector<8x128xf32>
    %c1_46 = arith.constant 1 : index
    %c0_47 = arith.constant 0 : index
    %c0_48 = arith.constant 0 : index
    %116 = vector.load %arg4[%c1_46, %c0_47, %c0_48] : memref<2x128x128xbf16, #tpu.memory_space<vmem>>, vector<1x128x128xbf16>
    %117 = vector.shape_cast %116 : vector<1x128x128xbf16> to vector<128x128xbf16>
    %118 = arith.truncf %115 : vector<8x128xf32> to vector<8x128xbf16>
    %cst_49 = arith.constant dense<0.000000e+00> : vector<8x128xf32>
    %119 = tpu.matmul %118, %117, %cst_49 {dimension_numbers = #tpu.dot_dimension_numbers<[1], [0], [0], [1], [0, 0, 1, 1], [], []>} : vector<8x128xbf16>, vector<128x128xbf16>, vector<8x128xf32> -> vector<8x128xf32>
    %120 = vector.broadcast %103 : vector<1x128xf32> to vector<8x128xf32>
    %121 = arith.addf %119, %120 : vector<8x128xf32>
    %122 = arith.addf %99, %121 : vector<8x128xf32>
    %cst_50 = arith.constant dense<0.000000e+00> : vector<8xf32>
    %123 = vector.multi_reduction <add>, %122, %cst_50 [1] : vector<8x128xf32> to vector<8xf32>
    %124 = vector.shape_cast %123 : vector<8xf32> to vector<8x1xf32>
    %cst_51 = arith.constant 1.280000e+02 : f32
    %125 = vector.broadcast %cst_51 : f32 to vector<8x1xf32>
    %126 = arith.divf %124, %125 : vector<8x1xf32>
    %127 = vector.broadcast %126 : vector<8x1xf32> to vector<8x128xf32>
    %128 = arith.subf %122, %127 : vector<8x128xf32>
    %129 = arith.mulf %128, %128 : vector<8x128xf32>
    %cst_52 = arith.constant dense<0.000000e+00> : vector<8xf32>
    %130 = vector.multi_reduction <add>, %129, %cst_52 [1] : vector<8x128xf32> to vector<8xf32>
    %131 = vector.shape_cast %130 : vector<8xf32> to vector<8x1xf32>
    %cst_53 = arith.constant 1.280000e+02 : f32
    %132 = vector.broadcast %cst_53 : f32 to vector<8x1xf32>
    %133 = arith.divf %131, %132 : vector<8x1xf32>
    %134 = vector.broadcast %126 : vector<8x1xf32> to vector<8x128xf32>
    %135 = arith.subf %122, %134 : vector<8x128xf32>
    %cst_54 = arith.constant 9.99999974E-6 : f32
    %136 = vector.broadcast %cst_54 : f32 to vector<8x1xf32>
    %137 = arith.addf %133, %136 : vector<8x1xf32>
    %138 = math.rsqrt %137 : vector<8x1xf32>
    %139 = vector.broadcast %138 : vector<8x1xf32> to vector<8x128xf32>
    %140 = arith.mulf %135, %139 : vector<8x128xf32>
    %141 = vector.broadcast %106 : vector<1x128xf32> to vector<8x128xf32>
    %142 = arith.mulf %140, %141 : vector<8x128xf32>
    %143 = vector.broadcast %107 : vector<1x128xf32> to vector<8x128xf32>
    %144 = arith.addf %142, %143 : vector<8x128xf32>
    %c1_55 = arith.constant 1 : index
    %c0_56 = arith.constant 0 : index
    %c0_57 = arith.constant 0 : index
    %145 = vector.load %arg5[%c1_55, %c0_56, %c0_57] : memref<2x128x512xbf16, #tpu.memory_space<vmem>>, vector<1x128x512xbf16>
    %146 = vector.shape_cast %145 : vector<1x128x512xbf16> to vector<128x512xbf16>
    %147 = arith.truncf %144 : vector<8x128xf32> to vector<8x128xbf16>
    %cst_58 = arith.constant dense<0.000000e+00> : vector<8x512xf32>
    %148 = tpu.matmul %147, %146, %cst_58 {dimension_numbers = #tpu.dot_dimension_numbers<[1], [0], [0], [1], [0, 0, 1, 1], [], []>} : vector<8x128xbf16>, vector<128x512xbf16>, vector<8x512xf32> -> vector<8x512xf32>
    %149 = vector.broadcast %104 : vector<1x512xf32> to vector<8x512xf32>
    %150 = arith.addf %148, %149 : vector<8x512xf32>
    %cst_59 = arith.constant 0.000000e+00 : f32
    %151 = vector.broadcast %cst_59 : f32 to vector<8x512xf32>
    %152 = arith.maximumf %150, %151 : vector<8x512xf32>
    %c1_60 = arith.constant 1 : index
    %c0_61 = arith.constant 0 : index
    %c0_62 = arith.constant 0 : index
    %153 = vector.load %arg6[%c1_60, %c0_61, %c0_62] : memref<2x512x128xbf16, #tpu.memory_space<vmem>>, vector<1x512x128xbf16>
    %154 = vector.shape_cast %153 : vector<1x512x128xbf16> to vector<512x128xbf16>
    %155 = arith.truncf %152 : vector<8x512xf32> to vector<8x512xbf16>
    %cst_63 = arith.constant dense<0.000000e+00> : vector<8x128xf32>
    %156 = tpu.matmul %155, %154, %cst_63 {dimension_numbers = #tpu.dot_dimension_numbers<[1], [0], [0], [1], [0, 0, 1, 1], [], []>} : vector<8x512xbf16>, vector<512x128xbf16>, vector<8x128xf32> -> vector<8x128xf32>
    %157 = vector.broadcast %105 : vector<1x128xf32> to vector<8x128xf32>
    %158 = arith.addf %156, %157 : vector<8x128xf32>
    %159 = arith.addf %144, %158 : vector<8x128xf32>
    %cst_64 = arith.constant dense<0.000000e+00> : vector<8xf32>
    %160 = vector.multi_reduction <add>, %159, %cst_64 [1] : vector<8x128xf32> to vector<8xf32>
    %161 = vector.shape_cast %160 : vector<8xf32> to vector<8x1xf32>
    %cst_65 = arith.constant 1.280000e+02 : f32
    %162 = vector.broadcast %cst_65 : f32 to vector<8x1xf32>
    %163 = arith.divf %161, %162 : vector<8x1xf32>
    %164 = vector.broadcast %163 : vector<8x1xf32> to vector<8x128xf32>
    %165 = arith.subf %159, %164 : vector<8x128xf32>
    %166 = arith.mulf %165, %165 : vector<8x128xf32>
    %cst_66 = arith.constant dense<0.000000e+00> : vector<8xf32>
    %167 = vector.multi_reduction <add>, %166, %cst_66 [1] : vector<8x128xf32> to vector<8xf32>
    %168 = vector.shape_cast %167 : vector<8xf32> to vector<8x1xf32>
    %cst_67 = arith.constant 1.280000e+02 : f32
    %169 = vector.broadcast %cst_67 : f32 to vector<8x1xf32>
    %170 = arith.divf %168, %169 : vector<8x1xf32>
    %171 = vector.broadcast %163 : vector<8x1xf32> to vector<8x128xf32>
    %172 = arith.subf %159, %171 : vector<8x128xf32>
    %cst_68 = arith.constant 9.99999974E-6 : f32
    %173 = vector.broadcast %cst_68 : f32 to vector<8x1xf32>
    %174 = arith.addf %170, %173 : vector<8x1xf32>
    %175 = math.rsqrt %174 : vector<8x1xf32>
    %176 = vector.broadcast %175 : vector<8x1xf32> to vector<8x128xf32>
    %177 = arith.mulf %172, %176 : vector<8x128xf32>
    %178 = vector.broadcast %108 : vector<1x128xf32> to vector<8x128xf32>
    %179 = arith.mulf %177, %178 : vector<8x128xf32>
    %180 = vector.broadcast %109 : vector<1x128xf32> to vector<8x128xf32>
    %181 = arith.addf %179, %180 : vector<8x128xf32>
    %c0_69 = arith.constant 0 : index
    %c0_70 = arith.constant 0 : index
    %182 = vector.load %arg7[%c0_69, %c0_70] : memref<128x64xbf16, #tpu.memory_space<vmem>>, vector<128x64xbf16>
    %183 = arith.truncf %181 : vector<8x128xf32> to vector<8x128xbf16>
    %cst_71 = arith.constant dense<0.000000e+00> : vector<8x64xf32>
    %184 = tpu.matmul %183, %182, %cst_71 {dimension_numbers = #tpu.dot_dimension_numbers<[1], [0], [0], [1], [0, 0, 1, 1], [], []>} : vector<8x128xbf16>, vector<128x64xbf16>, vector<8x64xf32> -> vector<8x64xf32>
    %185 = vector.extract_strided_slice %1 {offsets = [2, 0], sizes = [1, 64], strides = [1, 1]} : vector<8x2048xf32> to vector<1x64xf32>
    %186 = vector.broadcast %185 : vector<1x64xf32> to vector<8x64xf32>
    %187 = arith.addf %184, %186 : vector<8x64xf32>
    %cst_72 = arith.constant 0.000000e+00 : f32
    %188 = vector.broadcast %cst_72 : f32 to vector<8x64xf32>
    %189 = arith.maximumf %187, %188 : vector<8x64xf32>
    %c0_73 = arith.constant 0 : index
    %c0_74 = arith.constant 0 : index
    %190 = vector.load %arg8[%c0_73, %c0_74] : memref<64x32xbf16, #tpu.memory_space<vmem>>, vector<64x32xbf16>
    %191 = arith.truncf %189 : vector<8x64xf32> to vector<8x64xbf16>
    %cst_75 = arith.constant dense<0.000000e+00> : vector<8x32xf32>
    %192 = tpu.matmul %191, %190, %cst_75 {dimension_numbers = #tpu.dot_dimension_numbers<[1], [0], [0], [1], [0, 0, 1, 1], [], []>} : vector<8x64xbf16>, vector<64x32xbf16>, vector<8x32xf32> -> vector<8x32xf32>
    %193 = vector.extract_strided_slice %1 {offsets = [3, 0], sizes = [1, 32], strides = [1, 1]} : vector<8x2048xf32> to vector<1x32xf32>
    %194 = vector.broadcast %193 : vector<1x32xf32> to vector<8x32xf32>
    %195 = arith.addf %192, %194 : vector<8x32xf32>
    %cst_76 = arith.constant 0.000000e+00 : f32
    %196 = vector.broadcast %cst_76 : f32 to vector<8x32xf32>
    %197 = arith.maximumf %195, %196 : vector<8x32xf32>
    %c0_77 = arith.constant 0 : index
    %c0_78 = arith.constant 0 : index
    %198 = vector.load %arg9[%c0_77, %c0_78] : memref<32x2048xbf16, #tpu.memory_space<vmem>>, vector<32x2048xbf16>
    %199 = arith.truncf %197 : vector<8x32xf32> to vector<8x32xbf16>
    %cst_79 = arith.constant dense<0.000000e+00> : vector<8x2048xf32>
    %200 = tpu.matmul %199, %198, %cst_79 {dimension_numbers = #tpu.dot_dimension_numbers<[1], [0], [0], [1], [0, 0, 1, 1], [], []>} : vector<8x32xbf16>, vector<32x2048xbf16>, vector<8x2048xf32> -> vector<8x2048xf32>
    %201 = vector.extract_strided_slice %1 {offsets = [4, 0], sizes = [1, 2048], strides = [1, 1]} : vector<8x2048xf32> to vector<1x2048xf32>
    %202 = vector.broadcast %201 : vector<1x2048xf32> to vector<8x2048xf32>
    %203 = arith.addf %200, %202 : vector<8x2048xf32>
    %204 = math.tanh %203 : vector<8x2048xf32>
    %c0_80 = arith.constant 0 : index
    %c0_81 = arith.constant 0 : index
    %205 = vector.load %arg12[%c0_80, %c0_81] : memref<8x2048xf32, #tpu.memory_space<vmem>>, vector<8x2048xf32>
    tpu.vector_store %arg12[%c0_80, %c0_81], %204 {strides = array<i32>} : memref<8x2048xf32, #tpu.memory_space<vmem>>, vector<8x2048xf32>,
    return
  }
}

</mosaic_0001>

<bundles_post_ra>
// kernel: forward.1
= control target key start
LH: loop header
LB: loop body
LE: loop exit
PB: predicated region body
PF: predicated region fallthrough
CT: control target
= control target key end

     0   :  { %17 = vsyncpa [#allocation3], 0  ;;  %s6277_s0 = inlined_call_operand.vmem [shape: f32[8,2048], index: 0, kind: input, shape index: {}]   ;;  %s6278_s1 = inlined_call_operand.hbm [shape: bf16[2048,128], index: 1, kind: input, shape index: {}]   ;;  %s6279_s2 = inlined_call_operand.hbm [shape: bf16[128,128], index: 2, kind: input, shape index: {}]   ;;  %s6280_s3 = inlined_call_operand.hbm [shape: bf16[2,128,128], index: 3, kind: input, shape index: {}]   ;;  %s6281_s4 = inlined_call_operand.hbm [shape: bf16[2,128,128], index: 4, kind: input, shape index: {}]   ;;  %s6282_s5 = inlined_call_operand.hbm [shape: bf16[2,128,512], index: 5, kind: input, shape index: {}]   ;;  %s6283_s6 = inlined_call_operand.hbm [shape: bf16[2,512,128], index: 6, kind: input, shape index: {}]   ;;  %s6284_s7 = inlined_call_operand.vmem [shape: bf16[128,64], index: 7, kind: input, shape index: {}]   ;;  %s6285_s8 = inlined_call_operand.vmem [shape: bf16[64,32], index: 8, kind: input, shape index: {}]   ;;  %s6286_s9 = inlined_call_operand.hbm [shape: bf16[32,2048], index: 9, kind: input, shape index: {}]   ;;  %s6287_s10 = inlined_call_operand.hbm [shape: f32[8,2048], index: 10, kind: input, shape index: {}]   ;;  %s6288_s11 = inlined_call_operand.hbm [shape: f32[2,8,512], index: 11, kind: input, shape index: {}]   ;;  %s6289_s12 = inlined_call_operand.hbm [shape: f32[8,2048], index: 12, kind: output, shape index: {}]  }
   0x1   :  { %18 = vsyncpa [#allocation6], 0 }
   0x2   :  { %19 = vsyncpa [#allocation9], 0 }
   0x3   :  { %20 = vsyncpa [#allocation12], 0 }
   0x4   :  { %21 = vsyncpa [#allocation15], 0 }
   0x5   :  { %22 = vsyncpa [#allocation4], 0  ;;  %s5755_s21 = smov [#allocation5]   ;;  %s5756_s23 = smov [#allocation8]  }
   0x6   :  { %s42_s22 = sshll.u32 %s5755_s21, 4  ;;  %s66_s24 = sshll.u32 %s5756_s23, 4  ;;  %s43_s22 = int_to_ptr.vmem [resolvable:$true] %s42_s22  ;;  %s5840_s24 = int_to_ptr.vmem [resolvable:$true] %s66_s24 }
   0x7   :  { %s5523_s27 = scalar_lea.hbm %s6279_s2, 1024 }
   0x8   :  { %p5524_p0 = scmp.ne.s32.totalorder %s6279_s2, %s5523_s27  ;;  %p5527_p1 = scmp.lt.u32.totalorder %s5523_s27, %s6279_s2 }
   0xa   :  { %p5529_p2 = pnand %p5527_p1, %p5524_p0 }
   0xc   :  { %5532 = shalt.err (!%p5529_p2)
}
   0xd   :  { %s5533_s14 = scalar_lea.vmem %s43_s22, 1024  ;;  %p5538_p4 = scmp.lt.s32.totalorder %s43_s22, %s43_s22 }
   0xe   :  { %p5534_p3 = scmp.ne.s32.totalorder %s43_s22, %s5533_s14  ;;  %p5539_p5 = scmp.lt.s32.totalorder %s5533_s14, %s5533_s14 }
  0x10   :  { %p5540_p6 = por %p5539_p5, %p5538_p4 }
  0x12   :  { %p5541_p7 = pnand %p5540_p6, %p5534_p3 }
  0x14   :  { %5544 = shalt.err (!%p5541_p7)
}
  0x15   :  { %s5757_s15 = smov 64   ;;  %s5758_s16 = smov 4  }
  0x16   :  { %48 = dma.hbm_to_vmem [thread:$0]  %s6279_s2, 1024, %s43_s22, [#allocation6], %s5757_s15, %s5757_s15, %s5758_s16  }
  0x17   :  { %s5545_s21 = scalar_lea.hbm %s6281_s4, 2048 }
  0x18   :  { %p5546_p8 = scmp.ne.s32.totalorder %s6281_s4, %s5545_s21  ;;  %p5549_p9 = scmp.lt.u32.totalorder %s5545_s21, %s6281_s4 }
  0x1a   :  { %p5551_p10 = pnand %p5549_p9, %p5546_p8 }
  0x1c   :  { %5554 = shalt.err (!%p5551_p10)
}
  0x1d   :  { %s5555_s28 = scalar_lea.vmem %s5840_s24, 2048  ;;  %p5560_p12 = scmp.lt.s32.totalorder %s5840_s24, %s5840_s24 }
  0x1e   :  { %p5556_p11 = scmp.ne.s32.totalorder %s5840_s24, %s5555_s28  ;;  %p5561_p13 = scmp.lt.s32.totalorder %s5555_s28, %s5555_s28 }
  0x20   :  { %p5562_p0 = por %p5561_p13, %p5560_p12 }
  0x22   :  { %p5563_p1 = pnand %p5562_p0, %p5556_p11 }
  0x24   :  { %5566 = shalt.err (!%p5563_p1)
}
  0x25   :  { %72 = dma.hbm_to_vmem [thread:$0]  %s6281_s4, 2048, %s5840_s24, [#allocation9], %s5757_s15, %s5757_s15, %s5758_s16  }
  0x26   :  { %s5759_s29 = smov [#allocation11]   ;;  %s5760_s13 = smov [#allocation14]  }
  0x27   :  { %s90_s30 = sshll.u32 %s5759_s29, 4  ;;  %s119_s14 = sshll.u32 %s5760_s13, 4  ;;  %s91_s30 = int_to_ptr.vmem [resolvable:$true] %s90_s30  ;;  %s120_s14 = int_to_ptr.vmem [resolvable:$true] %s119_s14 }
  0x28   :  { %s5567_s19 = scalar_lea.hbm %s6283_s6, 8192 }
  0x29   :  { %p5568_p2 = scmp.ne.s32.totalorder %s6283_s6, %s5567_s19  ;;  %p5571_p3 = scmp.lt.u32.totalorder %s5567_s19, %s6283_s6 }
  0x2b   :  { %p5573_p4 = pnand %p5571_p3, %p5568_p2 }
  0x2d   :  { %5576 = shalt.err (!%p5573_p4)
}
  0x2e   :  { %s5577_s4 = scalar_lea.vmem %s91_s30, 8192  ;;  %p5582_p6 = scmp.lt.s32.totalorder %s91_s30, %s91_s30 }
  0x2f   :  { %p5578_p5 = scmp.ne.s32.totalorder %s91_s30, %s5577_s4  ;;  %p5583_p7 = scmp.lt.s32.totalorder %s5577_s4, %s5577_s4 }
  0x31   :  { %p5584_p8 = por %p5583_p7, %p5582_p6 }
  0x33   :  { %p5585_p9 = pnand %p5584_p8, %p5578_p5 }
  0x35   :  { %5588 = shalt.err (!%p5585_p9)
}
  0x36   :  { %96 = dma.hbm_to_vmem [thread:$0]  %s6283_s6, 8192, %s91_s30, [#allocation12], %s5757_s15, %s5757_s15, %s5758_s16  }
  0x37   :  { %s5589_s2 = scalar_lea.hbm %s6287_s10, 2048 }
  0x38   :  { %p5590_p10 = scmp.ne.s32.totalorder %s6287_s10, %s5589_s2  ;;  %p5593_p11 = scmp.lt.u32.totalorder %s5589_s2, %s6287_s10 }
  0x3a   :  { %p5595_p12 = pnand %p5593_p11, %p5590_p10 }
  0x3c   :  { %5598 = shalt.err (!%p5595_p12)
}
  0x3d   :  { %s5599_s18 = scalar_lea.vmem %s120_s14, 2048  ;;  %p5604_p0 = scmp.lt.s32.totalorder %s120_s14, %s120_s14 }
  0x3e   :  { %p5600_p13 = scmp.ne.s32.totalorder %s120_s14, %s5599_s18  ;;  %p5605_p1 = scmp.lt.s32.totalorder %s5599_s18, %s5599_s18 }
  0x40   :  { %p5606_p2 = por %p5605_p1, %p5604_p0 }
  0x42   :  { %p5607_p3 = pnand %p5606_p2, %p5600_p13 }
  0x44   :  { %5610 = shalt.err (!%p5607_p3)
}
  0x45   :  { %122 = dma.hbm_to_vmem [thread:$0]  %s6287_s10, 2048, %s120_s14, [#allocation15]  }
  0x46   :  { %s5761_s19 = smov [#allocation2]   ;;  %s5762_s21 = smov [#allocation7]  }
  0x47   :  { %s30_s20 = sshll.u32 %s5761_s19, 4  ;;  %s54_s23 = sshll.u32 %s5762_s21, 4  ;;  %s31_s20 = int_to_ptr.vmem [resolvable:$true] %s30_s20  ;;  %s5904_s23 = int_to_ptr.vmem [resolvable:$true] %s54_s23 }
  0x48   :  { %s5611_s24 = scalar_lea.hbm %s6278_s1, 16384 }
  0x49   :  { %p5612_p4 = scmp.ne.s32.totalorder %s6278_s1, %s5611_s24  ;;  %p5615_p5 = scmp.lt.u32.totalorder %s5611_s24, %s6278_s1 }
  0x4b   :  { %p5617_p6 = pnand %p5615_p5, %p5612_p4 }
  0x4d   :  { %5620 = shalt.err (!%p5617_p6)
}
  0x4e   :  { %s5621_s10 = scalar_lea.vmem %s31_s20, 16384  ;;  %p5626_p8 = scmp.lt.s32.totalorder %s31_s20, %s31_s20 }
  0x4f   :  { %p5622_p7 = scmp.ne.s32.totalorder %s31_s20, %s5621_s10  ;;  %p5627_p9 = scmp.lt.s32.totalorder %s5621_s10, %s5621_s10 }
  0x51   :  { %p5628_p10 = por %p5627_p9, %p5626_p8 }
  0x53   :  { %p5629_p11 = pnand %p5628_p10, %p5622_p7 }
  0x55   :  { %5632 = shalt.err (!%p5629_p11)
}
  0x56   :  { %36 = dma.hbm_to_vmem [thread:$0]  %s6278_s1, 16384, %s31_s20, [#allocation3], %s5757_s15, %s5757_s15, %s5758_s16  }
  0x57   :  { %s5633_s17 = scalar_lea.hbm %s6280_s3, 2048 }
  0x58   :  { %p5634_p12 = scmp.ne.s32.totalorder %s6280_s3, %s5633_s17  ;;  %p5637_p13 = scmp.lt.u32.totalorder %s5633_s17, %s6280_s3 }
  0x5a   :  { %p5639_p0 = pnand %p5637_p13, %p5634_p12 }
  0x5c   :  { %5642 = shalt.err (!%p5639_p0)
}
  0x5d   :  { %s5643_s21 = scalar_lea.vmem %s5904_s23, 2048  ;;  %p5648_p2 = scmp.lt.s32.totalorder %s5904_s23, %s5904_s23 }
  0x5e   :  { %p5644_p1 = scmp.ne.s32.totalorder %s5904_s23, %s5643_s21  ;;  %p5649_p3 = scmp.lt.s32.totalorder %s5643_s21, %s5643_s21 }
  0x60   :  { %p5650_p4 = por %p5649_p3, %p5648_p2 }
  0x62   :  { %p5651_p5 = pnand %p5650_p4, %p5644_p1 }
  0x64   :  { %5654 = shalt.err (!%p5651_p5)
}
  0x65   :  { %60 = dma.hbm_to_vmem [thread:$0]  %s6280_s3, 2048, %s5904_s23, [#allocation6], %s5757_s15, %s5757_s15, %s5758_s16  }
  0x66   :  { %s5763_s25 = smov [#allocation10]   ;;  %s5655_s27 = scalar_lea.hbm %s6282_s5, 8192 }
  0x67   :  { %s78_s4 = sshll.u32 %s5763_s25, 4  ;;  %p5656_p6 = scmp.ne.s32.totalorder %s6282_s5, %s5655_s27  ;;  %s79_s4 = int_to_ptr.vmem [resolvable:$true] %s78_s4 }
  0x68   :  { %p5659_p7 = scmp.lt.u32.totalorder %s5655_s27, %s6282_s5 }
  0x6a   :  { %p5661_p8 = pnand %p5659_p7, %p5656_p6 }
  0x6c   :  { %5664 = shalt.err (!%p5661_p8)
}
  0x6d   :  { %s5665_s22 = scalar_lea.vmem %s79_s4, 8192  ;;  %p5670_p10 = scmp.lt.s32.totalorder %s79_s4, %s79_s4 }
  0x6e   :  { %p5666_p9 = scmp.ne.s32.totalorder %s79_s4, %s5665_s22  ;;  %p5671_p11 = scmp.lt.s32.totalorder %s5665_s22, %s5665_s22 }
  0x70   :  { %p5672_p12 = por %p5671_p11, %p5670_p10 }
  0x72   :  { %p5673_p13 = pnand %p5672_p12, %p5666_p9 }
  0x74   :  { %5676 = shalt.err (!%p5673_p13)
}
  0x75   :  { %s5764_s3 = smov 256   ;;  %s5765_s16 = smov 16  }
  0x76   :  { %84 = dma.hbm_to_vmem [thread:$0]  %s6282_s5, 8192, %s79_s4, [#allocation9], %s5764_s3, %s5764_s3, %s5765_s16  }
  0x77   :  { %s5766_s13 = smov [#allocation13]   ;;  %s5677_s30 = scalar_lea.hbm %s6286_s9, 4096 }
  0x78   :  { %s106_s17 = sshll.u32 %s5766_s13, 4  ;;  %p5678_p0 = scmp.ne.s32.totalorder %s6286_s9, %s5677_s30  ;;  %s107_s17 = int_to_ptr.vmem [resolvable:$true] %s106_s17 }
  0x79   :  { %p5681_p1 = scmp.lt.u32.totalorder %s5677_s30, %s6286_s9 }
  0x7b   :  { %p5683_p2 = pnand %p5681_p1, %p5678_p0 }
  0x7d   :  { %5686 = shalt.err (!%p5683_p2)
}
  0x7e   :  { %s5687_s25 = scalar_lea.vmem %s107_s17, 4096  ;;  %p5692_p4 = scmp.lt.s32.totalorder %s107_s17, %s107_s17 }
  0x7f   :  { %p5688_p3 = scmp.ne.s32.totalorder %s107_s17, %s5687_s25  ;;  %p5693_p5 = scmp.lt.s32.totalorder %s5687_s25, %s5687_s25 }
  0x81   :  { %p5694_p6 = por %p5693_p5, %p5692_p4 }
  0x83   :  { %p5695_p7 = pnand %p5694_p6, %p5688_p3 }
  0x85   :  { %5698 = shalt.err (!%p5695_p7)
}
  0x86   :  { %s5767_s5 = smov 1024   ;;  %s5768_s26 = smov [#allocation16]  }
  0x87   :  { %112 = dma.hbm_to_vmem [thread:$0]  %s6286_s9, 4096, %s107_s17, [#allocation12], %s5767_s5, %s5767_s5, %s5757_s15  }
  0x88   :  { %s128_s27 = sshll.u32 %s5768_s26, 4  ;;  %s5699_s10 = scalar_lea.hbm %s6288_s11, 1024  ;;  %s129_s27 = int_to_ptr.vmem [resolvable:$true] %s128_s27 }
  0x89   :  { %p5700_p8 = scmp.ne.s32.totalorder %s6288_s11, %s5699_s10  ;;  %p5703_p9 = scmp.lt.u32.totalorder %s5699_s10, %s6288_s11 }
  0x8b   :  { %p5705_p10 = pnand %p5703_p9, %p5700_p8 }
  0x8d   :  { %5708 = shalt.err (!%p5705_p10)
}
  0x8e   :  { %s5709_s23 = scalar_lea.vmem %s129_s27, 1024  ;;  %p5714_p12 = scmp.lt.s32.totalorder %s129_s27, %s129_s27 }
  0x8f   :  { %p5710_p11 = scmp.ne.s32.totalorder %s129_s27, %s5709_s23  ;;  %p5715_p13 = scmp.lt.s32.totalorder %s5709_s23, %s5709_s23 }
  0x91   :  { %p5716_p0 = por %p5715_p13, %p5714_p12 }
  0x93   :  { %p5717_p1 = pnand %p5716_p0, %p5710_p11 }
  0x95   :  { %5720 = shalt.err (!%p5717_p1)
}
  0x96   :  { %s5769_s9 = smov 512   ;;  %s5770_s15 = smov 32  }
  0x97   :  { %134 = dma.hbm_to_vmem [thread:$0]  %s6288_s11, 1024, %s129_s27, [#allocation15], %s5769_s9, %s5769_s9, %s5770_s15  }
  0x98   :  { %5743 = dma.done.wait [#allocation3], 16384  }
  0x99   :  { %5744 = vsyncadd [#allocation3], 4294950912 }
  0x9a   :  { %5745 = dma.done.wait [#allocation6], 3072  }
  0x9b   :  { %5746 = vsyncadd [#allocation6], 4294964224 }
  0x9c   :  { %5747 = dma.done.wait [#allocation9], 10240  }
  0x9d   :  { %5748 = vsyncadd [#allocation9], 4294957056 }
  0x9e   :  { %5749 = dma.done.wait [#allocation12], 12288  }
  0x9f   :  { %5750 = vsyncadd [#allocation12], 4294955008 }
  0xa0   :  { %5751 = dma.done.wait [#allocation15], 3072  }
  0xa1   :  { %5752 = vsyncadd [#allocation15], 4294964224  ;;  %v5142_v0 = vld [vmem:[#allocation2 + $0x40] sm:$0xff]   ;;  %v5146_v4 = vld [vmem:[#allocation2 + $0x48] sm:$0xff]   ;;  %vm5772_vm0 = vmmov 0   ;;  %vm3633_vm1 = vcmask 523264  }
  0xa2   :  { %v5143_v1 = vld [vmem:[#allocation2 + $0xc0] sm:$0xff]   ;;  %4667 = vmatprep.subr.bf16.mxu0 %v5142_v0  ;;  %v5147_v5 = vld [vmem:[#allocation2 + $0xc8] sm:$0xff]   ;;  %v5150_v8 = vld [vmem:[#allocation2 + $0x50] sm:$0xff]   ;;  %vm3935_vm2 = vcmask 261120  }
  0xa3   :  { %v5144_v2 = vld [vmem:[#allocation2] sm:$0xff]   ;;  %4689 = vmatprep.subr.bf16.mxu1 %v5143_v1  ;;  %v5148_v6 = vld [vmem:[#allocation2 + $0x8] sm:$0xff]   ;;  %v5151_v9 = vld [vmem:[#allocation2 + $0xd0] sm:$0xff]  }
  0xa4   :  { %v5145_v3 = vld [vmem:[#allocation2 + $0x80] sm:$0xff]   ;;  %4668 = vmatpush3.bf16.msra.mxu0 %v5144_v2  ;;  %v5149_v7 = vld [vmem:[#allocation2 + $0x88] sm:$0xff]   ;;  %v5152_v10 = vld [vmem:[#allocation2 + $0x10] sm:$0xff]  }
  0xa5   :  { %4690 = vmatpush3.bf16.msra.mxu1 %v5145_v3  ;;  %4669 = vmatprep.subr.bf16.mxu0 %v5146_v4  ;;  %v5153_v11 = vld [vmem:[#allocation2 + $0x90] sm:$0xff]   ;;  %v5154_v12 = vld [vmem:[#allocation2 + $0x58] sm:$0xff]   ;;  %v5158_v16 = vld [vmem:[#allocation2 + $0x60] sm:$0xff]  }
  0xa6   :  { %4691 = vmatprep.subr.bf16.mxu1 %v5147_v5  ;;  %v5155_v13 = vld [vmem:[#allocation2 + $0xd8] sm:$0xff]   ;;  %v5159_v17 = vld [vmem:[#allocation2 + $0xe0] sm:$0xff]   ;;  %v5162_v20 = vld [vmem:[#allocation2 + $0x68] sm:$0xff]  }
  0xa7   :  { %v5156_v14 = vld [vmem:[#allocation2 + $0x18] sm:$0xff]   ;;  %v5160_v18 = vld [vmem:[#allocation2 + $0x20] sm:$0xff]   ;;  %v5163_v21 = vld [vmem:[#allocation2 + $0xe8] sm:$0xff]  }
  0xa8   :  { %4670 = vmatpush3.bf16.msra.mxu0 %v5148_v6  ;;  %v5157_v15 = vld [vmem:[#allocation2 + $0x98] sm:$0xff]   ;;  %v5161_v19 = vld [vmem:[#allocation2 + $0xa0] sm:$0xff]   ;;  %v5164_v22 = vld [vmem:[#allocation2 + $0x28] sm:$0xff]  }
  0xa9   :  { %4692 = vmatpush3.bf16.msra.mxu1 %v5149_v7  ;;  %4671 = vmatprep.subr.bf16.mxu0 %v5150_v8  ;;  %v5165_v23 = vld [vmem:[#allocation2 + $0xa8] sm:$0xff]   ;;  %v5166_v24 = vld [vmem:[#allocation2 + $0x70] sm:$0xff]   ;;  %v5170_v28 = vld [vmem:[#allocation2 + $0x78] sm:$0xff]  }
  0xaa   :  { %4693 = vmatprep.subr.bf16.mxu1 %v5151_v9  ;;  %v5167_v25 = vld [vmem:[#allocation2 + $0xf0] sm:$0xff]   ;;  %v5171_v29 = vld [vmem:[#allocation2 + $0xf8] sm:$0xff]   ;;  %v164_v32 = vld [vmem:[%s6277_s0 + $0x8] sm:$0xff] }
  0xab   :  { %v5168_v26 = vld [vmem:[#allocation2 + $0x30] sm:$0xff]   ;;  %v5172_v30 = vld [vmem:[#allocation2 + $0x38] sm:$0xff]   ;;  %v163_v34 = vld [vmem:[%s6277_s0] sm:$0xff]  ;;  %v452_v35 = vpack.c.bf16 %v164_v32, %v164_v32 }
  0xac   :  { %4672 = vmatpush3.bf16.msra.mxu0 %v5152_v10  ;;  %v5169_v27 = vld [vmem:[#allocation2 + $0xb0] sm:$0xff]   ;;  %v5173_v31 = vld [vmem:[#allocation2 + $0xb8] sm:$0xff]   ;;  %v451_v37 = vpack.c.bf16 %v163_v34, %v163_v34  ;;  %v5174_v40 = vld [vmem:[#allocation2 + $0x140] sm:$0xff]  }
  0xad   :  { %4694 = vmatpush3.bf16.msra.mxu1 %v5153_v11  ;;  %4673 = vmatprep.subr.bf16.mxu0 %v5154_v12  ;;  %v166_v33 = vld [vmem:[%s6277_s0 + $0x18] sm:$0xff]  ;;  %v165_v38 = vld [vmem:[%s6277_s0 + $0x10] sm:$0xff]  ;;  %v5175_v41 = vld [vmem:[#allocation2 + $0x1c0] sm:$0xff]  }
  0xae   :  { %4695 = vmatprep.subr.bf16.mxu1 %v5155_v13  ;;  %v454_v36 = vpack.c.bf16 %v166_v33, %v166_v33  ;;  %v453_v39 = vpack.c.bf16 %v165_v38, %v165_v38  ;;  %1271 = vmatprep.mubr.bf16.mxu0 %v452_v35  ;;  %v5176_v42 = vld [vmem:[#allocation2 + $0x100] sm:$0xff]   ;;  %v5178_v44 = vld [vmem:[#allocation2 + $0x148] sm:$0xff]   ;;  %v5182_v48 = vld [vmem:[#allocation2 + $0x150] sm:$0xff]  }
  0xaf   :  { %v5177_v43 = vld [vmem:[#allocation2 + $0x180] sm:$0xff]   ;;  %v5179_v45 = vld [vmem:[#allocation2 + $0x1c8] sm:$0xff]   ;;  %v5183_v49 = vld [vmem:[#allocation2 + $0x1d0] sm:$0xff]  }
  0xb0   :  { %4674 = vmatpush3.bf16.msra.mxu0 %v5156_v14  ;;  %1311 = vmatprep.mubr.bf16.mxu1 %v454_v36  ;;  %v5180_v46 = vld [vmem:[#allocation2 + $0x108] sm:$0xff]   ;;  %v5184_v50 = vld [vmem:[#allocation2 + $0x110] sm:$0xff]   ;;  %v5186_v52 = vld [vmem:[#allocation2 + $0x158] sm:$0xff]  }
  0xb1   :  { %4696 = vmatpush3.bf16.msra.mxu1 %v5157_v15  ;;  %4675 = vmatprep.subr.bf16.mxu0 %v5158_v16  ;;  %v5181_v47 = vld [vmem:[#allocation2 + $0x188] sm:$0xff]   ;;  %v5185_v51 = vld [vmem:[#allocation2 + $0x190] sm:$0xff]   ;;  %v5187_v53 = vld [vmem:[#allocation2 + $0x1d8] sm:$0xff]  }
  0xb2   :  { %4697 = vmatprep.subr.bf16.mxu1 %v5159_v17  ;;  %v5188_v54 = vld [vmem:[#allocation2 + $0x118] sm:$0xff]   ;;  %v5190_v56 = vld [vmem:[#allocation2 + $0x160] sm:$0xff]   ;;  %v5194_v60 = vld [vmem:[#allocation2 + $0x168] sm:$0xff]  }
  0xb3   :  { %v5189_v55 = vld [vmem:[#allocation2 + $0x198] sm:$0xff]   ;;  %v5191_v57 = vld [vmem:[#allocation2 + $0x1e0] sm:$0xff]   ;;  %v5195_v61 = vld [vmem:[#allocation2 + $0x1e8] sm:$0xff]  }
  0xb4   :  { %4676 = vmatpush3.bf16.msra.mxu0 %v5160_v18  ;;  %v5192_v58 = vld [vmem:[#allocation2 + $0x120] sm:$0xff]   ;;  %v5196_v62 = vld [vmem:[#allocation2 + $0x128] sm:$0xff]   ;;  %v5198_v0 = vld [vmem:[#allocation2 + $0x170] sm:$0xff]  }
  0xb5   :  { %4698 = vmatpush3.bf16.msra.mxu1 %v5161_v19  ;;  %4677 = vmatprep.subr.bf16.mxu0 %v5162_v20  ;;  %v5193_v59 = vld [vmem:[#allocation2 + $0x1a0] sm:$0xff]   ;;  %v5197_v63 = vld [vmem:[#allocation2 + $0x1a8] sm:$0xff]   ;;  %v5199_v1 = vld [vmem:[#allocation2 + $0x1f0] sm:$0xff]  }
  0xb6   :  { %4699 = vmatprep.subr.bf16.mxu1 %v5163_v21  ;;  %v5200_v2 = vld [vmem:[#allocation2 + $0x130] sm:$0xff]   ;;  %v5202_v4 = vld [vmem:[#allocation2 + $0x178] sm:$0xff]   ;;  %v168_v8 = vld [vmem:[%s6277_s0 + $0x28] sm:$0xff] }
  0xb7   :  { %v5201_v3 = vld [vmem:[#allocation2 + $0x1b0] sm:$0xff]   ;;  %v5203_v5 = vld [vmem:[#allocation2 + $0x1f8] sm:$0xff]   ;;  %v456_v10 = vpack.c.bf16 %v168_v8, %v168_v8  ;;  %v167_v12 = vld [vmem:[%s6277_s0 + $0x20] sm:$0xff] }
  0xb8   :  { %4678 = vmatpush3.bf16.msra.mxu0 %v5164_v22  ;;  %v5204_v6 = vld [vmem:[#allocation2 + $0x138] sm:$0xff]   ;;  %v169_v13 = vld [vmem:[%s6277_s0 + $0x30] sm:$0xff]  ;;  %v455_v14 = vpack.c.bf16 %v167_v12, %v167_v12  ;;  %v5206_v16 = vld [vmem:[#allocation2 + $0x240] sm:$0xff]  }
  0xb9   :  { %4700 = vmatpush3.bf16.msra.mxu1 %v5165_v23  ;;  %4679 = vmatprep.subr.bf16.mxu0 %v5166_v24  ;;  %v5205_v7 = vld [vmem:[#allocation2 + $0x1b8] sm:$0xff]   ;;  %v457_v15 = vpack.c.bf16 %v169_v13, %v169_v13  ;;  %v5207_v17 = vld [vmem:[#allocation2 + $0x2c0] sm:$0xff]   ;;  %v5210_v20 = vld [vmem:[#allocation2 + $0x248] sm:$0xff]  }
  0xba   :  { %4701 = vmatprep.subr.bf16.mxu1 %v5167_v25  ;;  %v170_v9 = vld [vmem:[%s6277_s0 + $0x38] sm:$0xff]  ;;  %v5208_v18 = vld [vmem:[#allocation2 + $0x200] sm:$0xff]   ;;  %v5211_v21 = vld [vmem:[#allocation2 + $0x2c8] sm:$0xff]  }
  0xbb   :  { %v458_v11 = vpack.c.bf16 %v170_v9, %v170_v9  ;;  %v5209_v19 = vld [vmem:[#allocation2 + $0x280] sm:$0xff]   ;;  %v5212_v22 = vld [vmem:[#allocation2 + $0x208] sm:$0xff]   ;;  %v5214_v24 = vld [vmem:[#allocation2 + $0x250] sm:$0xff]  }
  0xbc   :  { %4680 = vmatpush3.bf16.msra.mxu0 %v5168_v26  ;;  %v5213_v23 = vld [vmem:[#allocation2 + $0x288] sm:$0xff]   ;;  %v5215_v25 = vld [vmem:[#allocation2 + $0x2d0] sm:$0xff]   ;;  %v5222_v32 = vld [vmem:[#allocation2 + $0x260] sm:$0xff]  }
  0xbd   :  { %4702 = vmatpush3.bf16.msra.mxu1 %v5169_v27  ;;  %4681 = vmatprep.subr.bf16.mxu0 %v5170_v28  ;;  %v5216_v26 = vld [vmem:[#allocation2 + $0x210] sm:$0xff]   ;;  %v5218_v28 = vld [vmem:[#allocation2 + $0x258] sm:$0xff]   ;;  %v5223_v33 = vld [vmem:[#allocation2 + $0x2e0] sm:$0xff]  }
  0xbe   :  { %4703 = vmatprep.subr.bf16.mxu1 %v5171_v29  ;;  %v5217_v27 = vld [vmem:[#allocation2 + $0x290] sm:$0xff]   ;;  %v5219_v29 = vld [vmem:[#allocation2 + $0x2d8] sm:$0xff]   ;;  %v5224_v34 = vld [vmem:[#allocation2 + $0x220] sm:$0xff]  }
  0xbf   :  { %v5225_v35 = vld [vmem:[#allocation2 + $0x2a0] sm:$0xff]   ;;  %v5226_v36 = vld [vmem:[#allocation2 + $0x268] sm:$0xff]  }
  0xc0   :  { %4682 = vmatpush3.bf16.msra.mxu0 %v5172_v30  ;;  %v5220_v30 = vld [vmem:[#allocation2 + $0x218] sm:$0xff]   ;;  %v5228_v38 = vld [vmem:[#allocation2 + $0x228] sm:$0xff]   ;;  %v5254_v8 = vld [vmem:[#allocation2 + $0x360] sm:$0xff]  }
  0xc1   :  { %4704 = vmatpush3.bf16.msra.mxu1 %v5173_v31  ;;  %4711 = vmatprep.subr.bf16.mxu0 %v5174_v40  ;;  %v5221_v31 = vld [vmem:[#allocation2 + $0x298] sm:$0xff]   ;;  %v5230_v40 = vld [vmem:[#allocation2 + $0x270] sm:$0xff]   ;;  %v5255_v9 = vld [vmem:[#allocation2 + $0x3e0] sm:$0xff]  }
  0xc2   :  { %4733 = vmatprep.subr.bf16.mxu1 %v5175_v41  ;;  %v5231_v41 = vld [vmem:[#allocation2 + $0x2f0] sm:$0xff]   ;;  %v5258_v12 = vld [vmem:[#allocation2 + $0x368] sm:$0xff]  }
  0xc3   :  { %1272 = vmatmul.mubr.bf16.vlgmr.msra.gmra.mrb[0].mxu0 %v451_v37  ;;  %v5227_v37 = vld [vmem:[#allocation2 + $0x2e8] sm:$0xff]  }
  0xc4   :  { %1312 = vmatmul.mubr.bf16.vlgmr.msra.gmra.mrb[0].mxu1 %v453_v39  ;;  %4712 = vmatpush3.bf16.msra.mxu0 %v5176_v42  ;;  %v5229_v39 = vld [vmem:[#allocation2 + $0x2a8] sm:$0xff]   ;;  %v5232_v42 = vld [vmem:[#allocation2 + $0x230] sm:$0xff]  }
  0xc5   :  { %4734 = vmatpush3.bf16.msra.mxu1 %v5177_v43  ;;  %4713 = vmatprep.subr.bf16.mxu0 %v5178_v44  ;;  %v5233_v43 = vld [vmem:[#allocation2 + $0x2b0] sm:$0xff]   ;;  %v5234_v44 = vld [vmem:[#allocation2 + $0x278] sm:$0xff]   ;;  %v5259_v13 = vld [vmem:[#allocation2 + $0x3e8] sm:$0xff]  }
  0xc6   :  { %4735 = vmatprep.subr.bf16.mxu1 %v5179_v45  ;;  %1351 = vmatprep.mubr.bf16.mxu0 %v456_v10  ;;  %v5235_v45 = vld [vmem:[#allocation2 + $0x2f8] sm:$0xff]   ;;  %v5256_v10 = vld [vmem:[#allocation2 + $0x320] sm:$0xff]  }
  0xc7   :  { %1391 = vmatprep.mubr.bf16.mxu1 %v458_v11  ;;  %v5257_v11 = vld [vmem:[#allocation2 + $0x3a0] sm:$0xff]  }
  0xc8   :  { %4714 = vmatpush3.bf16.msra.mxu0 %v5180_v46  ;;  %v5236_v46 = vld [vmem:[#allocation2 + $0x238] sm:$0xff]  }
  0xc9   :  { %4736 = vmatpush3.bf16.msra.mxu1 %v5181_v47  ;;  %4715 = vmatprep.subr.bf16.mxu0 %v5182_v48  ;;  %v5237_v47 = vld [vmem:[#allocation2 + $0x2b8] sm:$0xff]   ;;  %v172_v48 = vld [vmem:[%s6277_s0 + $0x48] sm:$0xff] }
  0xca   :  { %4737 = vmatprep.subr.bf16.mxu1 %v5183_v49  ;;  %v460_v49 = vpack.c.bf16 %v172_v48, %v172_v48  ;;  %v6048_v48 = vld [vmem:[#allocation14] sm:$0xff] }
  0xcc   :  { %4716 = vmatpush3.bf16.msra.mxu0 %v5184_v50  ;;  %v174_v50 = vld [vmem:[%s6277_s0 + $0x58] sm:$0xff] }
  0xcd   :  { %4738 = vmatpush3.bf16.msra.mxu1 %v5185_v51  ;;  %4717 = vmatprep.subr.bf16.mxu0 %v5186_v52  ;;  %v171_v51 = vld [vmem:[%s6277_s0 + $0x40] sm:$0xff]  ;;  %v173_v52 = vld [vmem:[%s6277_s0 + $0x50] sm:$0xff] }
  0xce   :  { %4739 = vmatprep.subr.bf16.mxu1 %v5187_v53  ;;  %v462_v53 = vpack.c.bf16 %v174_v50, %v174_v50 }
  0xd0   :  { %4718 = vmatpush3.bf16.msra.mxu0 %v5188_v54  ;;  %v459_v54 = vpack.c.bf16 %v171_v51, %v171_v51 }
  0xd1   :  { %4740 = vmatpush3.bf16.msra.mxu1 %v5189_v55  ;;  %4719 = vmatprep.subr.bf16.mxu0 %v5190_v56  ;;  %v461_v55 = vpack.c.bf16 %v173_v52, %v173_v52  ;;  %v5238_v56 = vld [vmem:[#allocation2 + $0x340] sm:$0xff]  }
  0xd2   :  { %4741 = vmatprep.subr.bf16.mxu1 %v5191_v57  ;;  %v5239_v57 = vld [vmem:[#allocation2 + $0x3c0] sm:$0xff]  }
  0xd4   :  { %4720 = vmatpush3.bf16.msra.mxu0 %v5192_v58  ;;  %v5240_v58 = vld [vmem:[#allocation2 + $0x300] sm:$0xff]  }
  0xd5   :  { %4742 = vmatpush3.bf16.msra.mxu1 %v5193_v59  ;;  %4721 = vmatprep.subr.bf16.mxu0 %v5194_v60  ;;  %v5241_v59 = vld [vmem:[#allocation2 + $0x380] sm:$0xff]   ;;  %v5242_v60 = vld [vmem:[#allocation2 + $0x348] sm:$0xff]  }
  0xd6   :  { %4743 = vmatprep.subr.bf16.mxu1 %v5195_v61  ;;  %v5243_v61 = vld [vmem:[#allocation2 + $0x3c8] sm:$0xff]  }
  0xd8   :  { %4722 = vmatpush3.bf16.msra.mxu0 %v5196_v62  ;;  %v5244_v62 = vld [vmem:[#allocation2 + $0x308] sm:$0xff]  }
  0xd9   :  { %4744 = vmatpush3.bf16.msra.mxu1 %v5197_v63  ;;  %4723 = vmatprep.subr.bf16.mxu0 %v5198_v0  ;;  %v5245_v63 = vld [vmem:[#allocation2 + $0x388] sm:$0xff]   ;;  %v5246_v0 = vld [vmem:[#allocation2 + $0x350] sm:$0xff]  }
  0xda   :  { %4745 = vmatprep.subr.bf16.mxu1 %v5199_v1  ;;  %v5247_v1 = vld [vmem:[#allocation2 + $0x3d0] sm:$0xff]  }
  0xdc   :  { %4724 = vmatpush3.bf16.msra.mxu0 %v5200_v2  ;;  %v5248_v2 = vld [vmem:[#allocation2 + $0x310] sm:$0xff]  }
  0xdd   :  { %4746 = vmatpush3.bf16.msra.mxu1 %v5201_v3  ;;  %4725 = vmatprep.subr.bf16.mxu0 %v5202_v4  ;;  %v5249_v3 = vld [vmem:[#allocation2 + $0x390] sm:$0xff]   ;;  %v5250_v4 = vld [vmem:[#allocation2 + $0x358] sm:$0xff]  }
  0xde   :  { %4747 = vmatprep.subr.bf16.mxu1 %v5203_v5  ;;  %v5251_v5 = vld [vmem:[#allocation2 + $0x3d8] sm:$0xff]  }
  0xe0   :  { %4726 = vmatpush3.bf16.msra.mxu0 %v5204_v6  ;;  %v5252_v6 = vld [vmem:[#allocation2 + $0x318] sm:$0xff]  }
  0xe1   :  { %4748 = vmatpush3.bf16.msra.mxu1 %v5205_v7  ;;  %4755 = vmatprep.subr.bf16.mxu0 %v5206_v16  ;;  %v5253_v7 = vld [vmem:[#allocation2 + $0x398] sm:$0xff]   ;;  %v5262_v16 = vld [vmem:[#allocation2 + $0x370] sm:$0xff]  }
  0xe2   :  { %4777 = vmatprep.subr.bf16.mxu1 %v5207_v17  ;;  %v5263_v17 = vld [vmem:[#allocation2 + $0x3f0] sm:$0xff]  }
  0xe3   :  { %1352 = vmatmul.mubr.bf16.vlgmr.msra.gmra.mrb[4].mxu0 %v455_v14  ;;  %v5260_v14 = vld [vmem:[#allocation2 + $0x328] sm:$0xff]  }
  0xe4   :  { %1392 = vmatmul.mubr.bf16.vlgmr.msra.gmra.mrb[4].mxu1 %v457_v15  ;;  %4756 = vmatpush3.bf16.msra.mxu0 %v5208_v18  ;;  %v5261_v15 = vld [vmem:[#allocation2 + $0x3a8] sm:$0xff]   ;;  %v5264_v18 = vld [vmem:[#allocation2 + $0x330] sm:$0xff]  }
  0xe5   :  { %4778 = vmatpush3.bf16.msra.mxu1 %v5209_v19  ;;  %4757 = vmatprep.subr.bf16.mxu0 %v5210_v20  ;;  %v5265_v19 = vld [vmem:[#allocation2 + $0x3b0] sm:$0xff]   ;;  %v5266_v20 = vld [vmem:[#allocation2 + $0x378] sm:$0xff]  }
  0xe6   :  { %4779 = vmatprep.subr.bf16.mxu1 %v5211_v21  ;;  %1431 = vmatprep.mubr.bf16.mxu0 %v460_v49  ;;  %v5267_v21 = vld [vmem:[#allocation2 + $0x3f8] sm:$0xff]   ;;  %v5282_v49 = vld [vmem:[#allocation7 + $0x20] sm:$0xff]  }
  0xe7   :  { %1471 = vmatprep.mubr.bf16.mxu1 %v462_v53 }
  0xe8   :  { %4758 = vmatpush3.bf16.msra.mxu0 %v5212_v22  ;;  %v5268_v22 = vld [vmem:[#allocation2 + $0x338] sm:$0xff]  }
  0xe9   :  { %4780 = vmatpush3.bf16.msra.mxu1 %v5213_v23  ;;  %4759 = vmatprep.subr.bf16.mxu0 %v5214_v24  ;;  %v5269_v23 = vld [vmem:[#allocation2 + $0x3b8] sm:$0xff]   ;;  %v176_v24 = vld [vmem:[%s6277_s0 + $0x68] sm:$0xff] }
  0xea   :  { %4781 = vmatprep.subr.bf16.mxu1 %v5215_v25  ;;  %v178_v25 = vld [vmem:[%s6277_s0 + $0x78] sm:$0xff] }
  0xec   :  { %4760 = vmatpush3.bf16.msra.mxu0 %v5216_v26  ;;  %v175_v26 = vld [vmem:[%s6277_s0 + $0x60] sm:$0xff] }
  0xed   :  { %4782 = vmatpush3.bf16.msra.mxu1 %v5217_v27  ;;  %4761 = vmatprep.subr.bf16.mxu0 %v5218_v28  ;;  %v464_v27 = vpack.c.bf16 %v176_v24, %v176_v24  ;;  %v466_v28 = vpack.c.bf16 %v178_v25, %v178_v25 }
  0xee   :  { %4783 = vmatprep.subr.bf16.mxu1 %v5219_v29  ;;  %v463_v29 = vpack.c.bf16 %v175_v26, %v175_v26 }
  0xf0   :  { %4762 = vmatpush3.bf16.msra.mxu0 %v5220_v30  ;;  %v177_v30 = vld [vmem:[%s6277_s0 + $0x70] sm:$0xff] }
  0xf1   :  { %4784 = vmatpush3.bf16.msra.mxu1 %v5221_v31  ;;  %4763 = vmatprep.subr.bf16.mxu0 %v5222_v32  ;;  %v465_v31 = vpack.c.bf16 %v177_v30, %v177_v30  ;;  %v5270_v32 = vld [vmem:[#allocation5] sm:$0xff]  }
  0xf2   :  { %4785 = vmatprep.subr.bf16.mxu1 %v5223_v33  ;;  %v5771_v33 = vmov 0.0  }
  0xf4   :  { %4764 = vmatpush3.bf16.msra.mxu0 %v5224_v34  ;;  %v5271_v34 = vld [vmem:[#allocation5 + $0x8] sm:$0xff]  }
  0xf5   :  { %4786 = vmatpush3.bf16.msra.mxu1 %v5225_v35  ;;  %4765 = vmatprep.subr.bf16.mxu0 %v5226_v36  ;;  %v5272_v35 = vld [vmem:[#allocation5 + $0x10] sm:$0xff]   ;;  %v5273_v36 = vld [vmem:[#allocation5 + $0x18] sm:$0xff]  }
  0xf6   :  { %4787 = vmatprep.subr.bf16.mxu1 %v5227_v37  ;;  %v5274_v37 = vld [vmem:[#allocation5 + $0x20] sm:$0xff]  }
  0xf8   :  { %4766 = vmatpush3.bf16.msra.mxu0 %v5228_v38  ;;  %v5275_v38 = vld [vmem:[#allocation5 + $0x28] sm:$0xff]  }
  0xf9   :  { %4788 = vmatpush3.bf16.msra.mxu1 %v5229_v39  ;;  %4767 = vmatprep.subr.bf16.mxu0 %v5230_v40  ;;  %v5276_v39 = vld [vmem:[#allocation5 + $0x30] sm:$0xff]   ;;  %v5277_v40 = vld [vmem:[#allocation5 + $0x38] sm:$0xff]  }
  0xfa   :  { %4789 = vmatprep.subr.bf16.mxu1 %v5231_v41  ;;  %v5278_v41 = vld [vmem:[#allocation7] sm:$0xff]  }
  0xfc   :  { %4768 = vmatpush3.bf16.msra.mxu0 %v5232_v42  ;;  %v5279_v42 = vld [vmem:[#allocation7 + $0x8] sm:$0xff]  }
  0xfd   :  { %4790 = vmatpush3.bf16.msra.mxu1 %v5233_v43  ;;  %4769 = vmatprep.subr.bf16.mxu0 %v5234_v44  ;;  %v467_v43 = vlaneseq  ;;  %v5280_v44 = vld [vmem:[#allocation7 + $0x10] sm:$0xff]  }
  0xfe   :  { %4791 = vmatprep.subr.bf16.mxu1 %v5235_v45 }
  0xff   :  { %v6042_v45 = vshrl.u32 %v467_v43, 7  ;;  %v5288_v43 = vld [vmem:[#allocation8 + $0x10] sm:$0xff]  }
 0x100   :  { %4770 = vmatpush3.bf16.msra.mxu0 %v5236_v46  ;;  %v5281_v46 = vld [vmem:[#allocation7 + $0x18] sm:$0xff]  }
 0x101   :  { %4792 = vmatpush3.bf16.msra.mxu1 %v5237_v47  ;;  %4799 = vmatprep.subr.bf16.mxu0 %v5238_v56  ;;  %v6046_v47 = vsub.s32 0, %v6042_v45 }
 0x102   :  { %4821 = vmatprep.subr.bf16.mxu1 %v5239_v57 }
 0x103   :  { %1432 = vmatmul.mubr.bf16.vlgmr.msra.gmra.mrb[8].mxu0 %v459_v54  ;;  %v470_v52 = vrot.slane %v6048_v48, %v6046_v47 }
 0x104   :  { %1472 = vmatmul.mubr.bf16.vlgmr.msra.gmra.mrb[8].mxu1 %v461_v55  ;;  %4800 = vmatpush3.bf16.msra.mxu0 %v5240_v58 }
 0x105   :  { %4822 = vmatpush3.bf16.msra.mxu1 %v5241_v59  ;;  %4801 = vmatprep.subr.bf16.mxu0 %v5242_v60  ;;  %v5283_v59 = vld [vmem:[#allocation7 + $0x28] sm:$0xff]  }
 0x106   :  { %4823 = vmatprep.subr.bf16.mxu1 %v5243_v61  ;;  %1511 = vmatprep.mubr.bf16.mxu0 %v464_v27 }
 0x107   :  { %1551 = vmatprep.mubr.bf16.mxu1 %v466_v28 }
 0x108   :  { %4802 = vmatpush3.bf16.msra.mxu0 %v5244_v62 }
 0x109   :  { %4824 = vmatpush3.bf16.msra.mxu1 %v5245_v63  ;;  %4803 = vmatprep.subr.bf16.mxu0 %v5246_v0 }
 0x10a   :  { %4825 = vmatprep.subr.bf16.mxu1 %v5247_v1 }
 0x10c   :  { %4804 = vmatpush3.bf16.msra.mxu0 %v5248_v2 }
 0x10d   :  { %4826 = vmatpush3.bf16.msra.mxu1 %v5249_v3  ;;  %4805 = vmatprep.subr.bf16.mxu0 %v5250_v4 }
 0x10e   :  { %4827 = vmatprep.subr.bf16.mxu1 %v5251_v5 }
 0x110   :  { %4806 = vmatpush3.bf16.msra.mxu0 %v5252_v6 }
 0x111   :  { %4828 = vmatpush3.bf16.msra.mxu1 %v5253_v7  ;;  %4807 = vmatprep.subr.bf16.mxu0 %v5254_v8 }
 0x112   :  { %4829 = vmatprep.subr.bf16.mxu1 %v5255_v9 }
 0x114   :  { %4808 = vmatpush3.bf16.msra.mxu0 %v5256_v10 }
 0x115   :  { %4830 = vmatpush3.bf16.msra.mxu1 %v5257_v11  ;;  %4809 = vmatprep.subr.bf16.mxu0 %v5258_v12 }
 0x116   :  { %4831 = vmatprep.subr.bf16.mxu1 %v5259_v13 }
 0x118   :  { %4810 = vmatpush3.bf16.msra.mxu0 %v5260_v14 }
 0x119   :  { %4832 = vmatpush3.bf16.msra.mxu1 %v5261_v15  ;;  %4811 = vmatprep.subr.bf16.mxu0 %v5262_v16 }
 0x11a   :  { %4833 = vmatprep.subr.bf16.mxu1 %v5263_v17 }
 0x11c   :  { %4812 = vmatpush3.bf16.msra.mxu0 %v5264_v18 }
 0x11d   :  { %4834 = vmatpush3.bf16.msra.mxu1 %v5265_v19  ;;  %4813 = vmatprep.subr.bf16.mxu0 %v5266_v20 }
 0x11e   :  { %4835 = vmatprep.subr.bf16.mxu1 %v5267_v21 }
 0x120   :  { %4814 = vmatpush3.bf16.msra.mxu0 %v5268_v22 }
 0x121   :  { %4836 = vmatpush3.bf16.msra.mxu1 %v5269_v23  ;;  %4990 = vmatprep.subr.bf16.mxu0 %v5771_v33 }
 0x122   :  { %5010 = vmatprep.subr.bf16.mxu1 %v5771_v33 }
 0x123   :  { %1512 = vmatmul.mubr.bf16.vlgmr.msra.gmra.mrb[12].mxu0 %v463_v29 }
 0x124   :  { %1552 = vmatmul.mubr.bf16.vlgmr.msra.gmra.mrb[12].mxu1 %v465_v31  ;;  %4991 = vmatpush3.bf16.msra.mxu0 %v5270_v32 }
 0x125   :  { %4992 = vmatprep.subr.bf16.mxu0 %v5771_v33  ;;  %5006 = vmatprep.mubr.msk.bf16.mxu0 %vm5772_vm0, %v5771_v33 }
 0x126   :  { %5026 = vmatprep.mubr.msk.bf16.mxu1 %vm5772_vm0, %v5771_v33  ;;  %5011 = vmatpush3.bf16.msra.mxu1 %v5278_v41  ;;  %v5286_v41 = vld [vmem:[#allocation8] sm:$0xff]  }
 0x127   :  { %5012 = vmatprep.subr.bf16.mxu1 %v5771_v33 }
 0x128   :  { %4993 = vmatpush3.bf16.msra.mxu0 %v5271_v34 }
 0x129   :  { %4994 = vmatprep.subr.bf16.mxu0 %v5771_v33 }
 0x12a   :  { %5013 = vmatpush3.bf16.msra.mxu1 %v5279_v42  ;;  %v5287_v42 = vld [vmem:[#allocation8 + $0x8] sm:$0xff]  }
 0x12b   :  { %5014 = vmatprep.subr.bf16.mxu1 %v5771_v33 }
 0x12c   :  { %4995 = vmatpush3.bf16.msra.mxu0 %v5272_v35 }
 0x12d   :  { %4996 = vmatprep.subr.bf16.mxu0 %v5771_v33 }
 0x12e   :  { %5015 = vmatpush3.bf16.msra.mxu1 %v5280_v44  ;;  %v5289_v44 = vld [vmem:[#allocation8 + $0x18] sm:$0xff]  }
 0x12f   :  { %5016 = vmatprep.subr.bf16.mxu1 %v5771_v33 }
 0x130   :  { %4997 = vmatpush3.bf16.msra.mxu0 %v5273_v36 }
 0x131   :  { %4998 = vmatprep.subr.bf16.mxu0 %v5771_v33 }
 0x132   :  { %5017 = vmatpush3.bf16.msra.mxu1 %v5281_v46  ;;  %v5290_v46 = vld [vmem:[#allocation8 + $0x20] sm:$0xff]  }
 0x133   :  { %5018 = vmatprep.subr.bf16.mxu1 %v5771_v33 }
 0x134   :  { %4999 = vmatpush3.bf16.msra.mxu0 %v5274_v37 }
 0x135   :  { %5000 = vmatprep.subr.bf16.mxu0 %v5771_v33 }
 0x136   :  { %5019 = vmatpush3.bf16.msra.mxu1 %v5282_v49  ;;  %v5291_v49 = vld [vmem:[#allocation8 + $0x28] sm:$0xff]  }
 0x137   :  { %5020 = vmatprep.subr.bf16.mxu1 %v5771_v33 }
 0x138   :  { %5001 = vmatpush3.bf16.msra.mxu0 %v5275_v38 }
 0x139   :  { %5002 = vmatprep.subr.bf16.mxu0 %v5771_v33 }
 0x13a   :  { %5021 = vmatpush3.bf16.msra.mxu1 %v5283_v59 }
 0x13b   :  { %5022 = vmatprep.subr.bf16.mxu1 %v5771_v33 }
 0x13c   :  { %5003 = vmatpush3.bf16.msra.mxu0 %v5276_v39  ;;  %v5284_v39 = vld [vmem:[#allocation7 + $0x30] sm:$0xff]  }
 0x13d   :  { %5004 = vmatprep.subr.bf16.mxu0 %v5771_v33 }
 0x13e   :  { %5023 = vmatpush3.bf16.msra.mxu1 %v5284_v39  ;;  %v5327_v39 = vld [vmem:[#allocation10 + $0xa8] ss:$16 sps:$4 sm:$0xff]  }
 0x13f   :  { %5024 = vmatprep.subr.bf16.mxu1 %v5771_v33 }
 0x140   :  { %5005 = vmatpush3.bf16.msra.mxu0 %v5277_v40  ;;  %v5285_v40 = vld [vmem:[#allocation7 + $0x38] sm:$0xff]  }
 0x141   :  { %5030 = vmatprep.subr.bf16.mxu0 %v5771_v33 }
 0x142   :  { %5025 = vmatpush3.bf16.msra.mxu1 %v5285_v40  ;;  %v5332_v40 = vld [vmem:[#allocation10 + $0xc4] ss:$16 sps:$4 sm:$0xff]  }
 0x196   :  { %v4683_v50 = vpop.f32.mrb[0].mxu0 }
 0x197   :  { %v4705_v51 = vpop.f32.mrb[0].mxu1  ;;  %v4684_v53 = vpop.f32.mrb[1].mxu0 }
 0x198   :  { %v4706_v54 = vpop.f32.mrb[1].mxu1  ;;  %v4685_v55 = vadd.f32 %v4684_v53, %v4683_v50  ;;  %v4686_v57 = vpop.f32.mrb[2].mxu0  ;;  %v5292_v50 = vld [vmem:[#allocation8 + $0x30] sm:$0xff]  }
 0x199   :  { %v4707_v56 = vadd.f32 %v4706_v54, %v4705_v51  ;;  %v4708_v58 = vpop.f32.mrb[2].mxu1  ;;  %v4687_v60 = vpop.f32.mrb[3].mxu0  ;;  %v6066_v51 = vsub.s32 1, %v6042_v45 }
 0x19a   :  { %v4709_v61 = vpop.f32.mrb[3].mxu1  ;;  %v1274_v62 = vadd.f32 %v4685_v55, %v470_v52  ;;  %v5293_v60 = vld [vmem:[#allocation8 + $0x38] sm:$0xff]  }
 0x19b   :  { %v1580_v52 = vrot.slane %v6048_v48, %v6066_v51  ;;  %v6070_v61 = vld [vmem:[#allocation16] sm:$0xff] }
 0x19c   :  { %v1314_v63 = vadd.f32 %v4707_v56, %v1274_v62  ;;  %v1694_v62 = vrot.slane %v6070_v61, %v6046_v47 }
 0x1b6   :  { %v4727_v0 = vpop.f32.mrb[4].mxu0 }
 0x1b7   :  { %v4749_v1 = vpop.f32.mrb[4].mxu1  ;;  %v4728_v2 = vpop.f32.mrb[5].mxu0 }
 0x1b8   :  { %v4729_v3 = vadd.f32 %v4728_v2, %v4727_v0  ;;  %v4750_v4 = vpop.f32.mrb[5].mxu1  ;;  %v4730_v5 = vpop.f32.mrb[6].mxu0 }
 0x1b9   :  { %v4751_v6 = vadd.f32 %v4750_v4, %v4749_v1  ;;  %v4752_v7 = vpop.f32.mrb[6].mxu1  ;;  %v4731_v8 = vpop.f32.mrb[7].mxu0  ;;  %v1803_v4 = vrot.slane %v6070_v61, %v6066_v51 }
 0x1ba   :  { %v1354_v9 = vadd.f32 %v4729_v3, %v1314_v63  ;;  %v4753_v10 = vpop.f32.mrb[7].mxu1 }
 0x1bc   :  { %v1394_v11 = vadd.f32 %v4751_v6, %v1354_v9 }
 0x1d6   :  { %v4771_v12 = vpop.f32.mrb[8].mxu0 }
 0x1d7   :  { %v4793_v13 = vpop.f32.mrb[8].mxu1  ;;  %v4772_v14 = vpop.f32.mrb[9].mxu0 }
 0x1d8   :  { %v4773_v15 = vadd.f32 %v4772_v14, %v4771_v12  ;;  %v4794_v16 = vpop.f32.mrb[9].mxu1  ;;  %v4774_v17 = vpop.f32.mrb[10].mxu0  ;;  %v5296_v12 = vld [vmem:[#allocation10 + $0x4] ss:$16 sps:$4 sm:$0xff]   ;;  %v5299_v14 = vld [vmem:[#allocation10 + $0xc] ss:$16 sps:$4 sm:$0xff]  }
 0x1d9   :  { %v4795_v18 = vadd.f32 %v4794_v16, %v4793_v13  ;;  %v4796_v19 = vpop.f32.mrb[10].mxu1  ;;  %v4775_v20 = vpop.f32.mrb[11].mxu0  ;;  %v5297_v13 = vld [vmem:[#allocation10 + $0x8] ss:$16 sps:$4 sm:$0xff]   ;;  %2124 = vmatprep.subr.bf16.mxu1 %v5296_v12  ;;  %v5305_v16 = vld [vmem:[#allocation10 + $0x2c] ss:$16 sps:$4 sm:$0xff]  }
 0x1da   :  { %v1434_v21 = vadd.f32 %v4773_v15, %v1394_v11  ;;  %v4797_v22 = vpop.f32.mrb[11].mxu1  ;;  %v5294_v11 = vld [vmem:[#allocation10] ss:$16 sps:$4 sm:$0xff]   ;;  %v5302_v15 = vld [vmem:[#allocation10 + $0x24] ss:$16 sps:$4 sm:$0xff]  }
 0x1db   :  { %v5300_v17 = vld [vmem:[#allocation10 + $0x20] ss:$16 sps:$4 sm:$0xff]   ;;  %v5308_v19 = vld [vmem:[#allocation10 + $0x44] ss:$16 sps:$4 sm:$0xff]   ;;  %v5311_v20 = vld [vmem:[#allocation10 + $0x4c] ss:$16 sps:$4 sm:$0xff]  }
 0x1dc   :  { %v1474_v23 = vadd.f32 %v4795_v18, %v1434_v21  ;;  %v5303_v18 = vld [vmem:[#allocation10 + $0x28] ss:$16 sps:$4 sm:$0xff]   ;;  %v5306_v21 = vld [vmem:[#allocation10 + $0x40] ss:$16 sps:$4 sm:$0xff]  }
 0x1dd   :  { %v5309_v22 = vld [vmem:[#allocation10 + $0x48] ss:$16 sps:$4 sm:$0xff]   ;;  %v5353_v12 = vld [vmem:[#allocation11 + $0x90] sm:$0xff]  }
 0x1f6   :  { %v4815_v24 = vpop.f32.mrb[12].mxu0 }
 0x1f7   :  { %v4837_v25 = vpop.f32.mrb[12].mxu1  ;;  %v4816_v26 = vpop.f32.mrb[13].mxu0 }
 0x1f8   :  { %v4838_v27 = vpop.f32.mrb[13].mxu1  ;;  %v4817_v28 = vadd.f32 %v4816_v26, %v4815_v24  ;;  %v4818_v30 = vpop.f32.mrb[14].mxu0 }
 0x1f9   :  { %v4839_v29 = vadd.f32 %v4838_v27, %v4837_v25  ;;  %v4840_v31 = vpop.f32.mrb[14].mxu1  ;;  %v4819_v32 = vpop.f32.mrb[15].mxu0  ;;  %v5314_v27 = vld [vmem:[#allocation10 + $0x64] ss:$16 sps:$4 sm:$0xff]   ;;  %v5315_v30 = vld [vmem:[#allocation10 + $0x68] ss:$16 sps:$4 sm:$0xff]  }
 0x1fa   :  { %v4841_v34 = vpop.f32.mrb[15].mxu1  ;;  %v1514_v35 = vadd.f32 %v4817_v28, %v1474_v23  ;;  %v5317_v28 = vld [vmem:[#allocation10 + $0x6c] ss:$16 sps:$4 sm:$0xff]   ;;  %v5320_v31 = vld [vmem:[#allocation10 + $0x84] ss:$16 sps:$4 sm:$0xff]  }
 0x1fb   :  { %v5323_v32 = vld [vmem:[#allocation10 + $0x8c] ss:$16 sps:$4 sm:$0xff]   ;;  %v5318_v34 = vld [vmem:[#allocation10 + $0x80] ss:$16 sps:$4 sm:$0xff]  }
 0x1fc   :  { %v1554_v36 = vadd.f32 %v4839_v29, %v1514_v35  ;;  %v5312_v29 = vld [vmem:[#allocation10 + $0x60] ss:$16 sps:$4 sm:$0xff]   ;;  %v5321_v35 = vld [vmem:[#allocation10 + $0x88] ss:$16 sps:$4 sm:$0xff]  }
 0x1fe   :  { %v1559_v37 = vmax.f32 %v1554_v36, 0.0  ;;  %v5326_v36 = vld [vmem:[#allocation10 + $0xa4] ss:$16 sps:$4 sm:$0xff]  }
 0x200   :  { %v1576_v38 = vpack.c.bf16 %v1559_v37, %v1559_v37  ;;  %v5329_v37 = vld [vmem:[#allocation10 + $0xac] ss:$16 sps:$4 sm:$0xff]  }
 0x202   :  { %5007 = vmatmul.mubr.bf16.vlgmr.msra.gmra.mrb[16].mxu0 %v1576_v38  ;;  %v5324_v38 = vld [vmem:[#allocation10 + $0xa0] ss:$16 sps:$4 sm:$0xff]  }
 0x203   :  { %5046 = vmatprep.mubr.msk.bf16.mxu0 %vm5772_vm0, %v5771_v33  ;;  %5031 = vmatpush3.bf16.msra.mxu0 %v5286_v41  ;;  %v5335_v41 = vld [vmem:[#allocation10 + $0xcc] ss:$16 sps:$4 sm:$0xff]  }
 0x204   :  { %5032 = vmatprep.subr.bf16.mxu0 %v5771_v33 }
 0x207   :  { %5033 = vmatpush3.bf16.msra.mxu0 %v5287_v42  ;;  %v5330_v42 = vld [vmem:[#allocation10 + $0xc0] ss:$16 sps:$4 sm:$0xff]  }
 0x208   :  { %5034 = vmatprep.subr.bf16.mxu0 %v5771_v33 }
 0x20b   :  { %5035 = vmatpush3.bf16.msra.mxu0 %v5288_v43  ;;  %v5333_v43 = vld [vmem:[#allocation10 + $0xc8] ss:$16 sps:$4 sm:$0xff]  }
 0x20c   :  { %5036 = vmatprep.subr.bf16.mxu0 %v5771_v33 }
 0x20f   :  { %5037 = vmatpush3.bf16.msra.mxu0 %v5289_v44  ;;  %v5336_v44 = vld [vmem:[#allocation10 + $0xe0] ss:$16 sps:$4 sm:$0xff]  }
 0x210   :  { %5038 = vmatprep.subr.bf16.mxu0 %v5771_v33 }
 0x213   :  { %5039 = vmatpush3.bf16.msra.mxu0 %v5290_v46  ;;  %v5338_v46 = vld [vmem:[#allocation10 + $0xe4] ss:$16 sps:$4 sm:$0xff]  }
 0x214   :  { %5040 = vmatprep.subr.bf16.mxu0 %v5771_v33 }
 0x217   :  { %5041 = vmatpush3.bf16.msra.mxu0 %v5291_v49  ;;  %v5339_v49 = vld [vmem:[#allocation10 + $0xe8] ss:$16 sps:$4 sm:$0xff]  }
 0x218   :  { %5042 = vmatprep.subr.bf16.mxu0 %v5771_v33 }
 0x21b   :  { %5043 = vmatpush3.bf16.msra.mxu0 %v5292_v50  ;;  %v5341_v50 = vld [vmem:[#allocation10 + $0xec] ss:$16 sps:$4 sm:$0xff]  }
 0x21c   :  { %5044 = vmatprep.subr.bf16.mxu0 %v5771_v33 }
 0x21f   :  { %5045 = vmatpush3.bf16.msra.mxu0 %v5293_v60 }
 0x220   :  { %2165 = vmatprep.subr.bf16.mxu0 %v5299_v14  ;;  %v5355_v14 = vld [vmem:[#allocation11 + $0xd8] sm:$0xff]  }
 0x2d5   :  { %v1663_v53 = vpop.f32.mrb[16].mxu0 }
 0x2d6   :  { %v1664_v54 = vadd.f32 %v1663_v53, %v1580_v52  ;;  %v5008_v55 = vpop.f32.mrb[17].mxu0  ;;  %v5773_v52 = vmov 0   ;;  %v5342_v53 = vld [vmem:[#allocation11 + $0x40] sm:$0xff]  }
 0x2d7   :  { %v1666_v56 = vpop.f32.mrb[18].mxu0 }
 0x2d8   :  { %v1669_v57 = vmax.f32 %v1664_v54, 0.0  ;;  %v5009_v58 = vpop.f32.mrb[19].mxu0  ;;  %v5343_v54 = vld [vmem:[#allocation11 + $0xc0] sm:$0xff]  }
 0x2d9   :  { %v6079_v58 = vsub.s32 4, %v6042_v45 }
 0x2da   :  { %v1690_v59 = vpack.c.bf16 %v1669_v57, %v1669_v57 }
 0x2db   :  { %v1908_v60 = vrot.slane %v6070_v61, %v6079_v58 }
 0x2dc   :  { %5027 = vmatmul.mubr.bf16.vlgmr.msra.gmra.mrb[16].mxu1 %v1690_v59  ;;  %v1912_v59 = vsub.s32 5, %v6042_v45 }
 0x2dd   :  { %2125 = vmatpush1.bf16.msra.mxu1 %v5294_v11  ;;  %2156 = vmatprep.mubr.bf16.mxu1 %v5773_v52  ;;  %v5352_v11 = vld [vmem:[#allocation11 + $0x10] sm:$0xff]  }
 0x2de   :  { %2126 = vmatprep.subr.bf16.mxu1 %v5302_v15  ;;  %v5356_v15 = vld [vmem:[#allocation11 + $0x18] sm:$0xff]  }
 0x2e1   :  { %2127 = vmatpush1.bf16.msra.mxu1 %v5300_v17  ;;  %v5358_v17 = vld [vmem:[#allocation11 + $0x60] sm:$0xff]  }
 0x2e2   :  { %2128 = vmatprep.subr.bf16.mxu1 %v5308_v19  ;;  %v5360_v19 = vld [vmem:[#allocation11 + $0x20] sm:$0xff]  }
 0x2e5   :  { %2129 = vmatpush1.bf16.msra.mxu1 %v5306_v21  ;;  %v5362_v21 = vld [vmem:[#allocation11 + $0x68] sm:$0xff]  }
 0x2e6   :  { %2130 = vmatprep.subr.bf16.mxu1 %v5314_v27  ;;  %v5368_v27 = vld [vmem:[#allocation11 + $0x30] sm:$0xff]  }
 0x2e9   :  { %2131 = vmatpush1.bf16.msra.mxu1 %v5312_v29  ;;  %v5370_v29 = vld [vmem:[#allocation11 + $0x78] sm:$0xff]  }
 0x2ea   :  { %2132 = vmatprep.subr.bf16.mxu1 %v5320_v31  ;;  %v5372_v31 = vld [vmem:[#allocation11 + $0x38] sm:$0xff]  }
 0x2ed   :  { %2133 = vmatpush1.bf16.msra.mxu1 %v5318_v34  ;;  %v6094_v34 = vsub.s32 2, %v6042_v45 }
 0x2ee   :  { %2134 = vmatprep.subr.bf16.mxu1 %v5326_v36  ;;  %v1671_v36 = vld [vmem:[#allocation16 + $0x8] sm:$0xff] }
 0x2f1   :  { %2135 = vmatpush1.bf16.msra.mxu1 %v5324_v38  ;;  %v1951_v38 = vrot.slane %v6070_v61, %v6094_v34 }
 0x2f2   :  { %2136 = vmatprep.subr.bf16.mxu1 %v5332_v40  ;;  %v1955_v40 = vrot.slane %v1671_v36, %v6094_v34  ;;  %v5384_v36 = vld [vmem:[#allocation8 + $0x50] sm:$0xff]  }
 0x2f5   :  { %2137 = vmatpush1.bf16.msra.mxu1 %v5330_v42 }
 0x2f6   :  { %2138 = vmatprep.subr.bf16.mxu1 %v5338_v46 }
 0x2f9   :  { %2139 = vmatpush1.bf16.msra.mxu1 %v5336_v44 }
 0x2fa   :  { %4870 = vmatprep.subr.bf16.mxu1 %v5342_v53 }
 0x3af   :  { %v1777_v63 = vpop.f32.mrb[16].mxu1 }
 0x3b0   :  { %v1778_v0 = vadd.f32 %v1777_v63, %v1694_v62  ;;  %v5028_v1 = vpop.f32.mrb[17].mxu1 }
 0x3b1   :  { %v1780_v2 = vpop.f32.mrb[18].mxu1 }
 0x3b2   :  { %v1799_v48 = vpack.c.bf16 %v1778_v0, %v1778_v0  ;;  %v5029_v3 = vpop.f32.mrb[19].mxu1  ;;  %v1913_v0 = vrot.slane %v6070_v61, %v1912_v59 }
 0x3b3   :  { %v5345_v3 = vld [vmem:[#allocation11 + $0x80] sm:$0xff]  }
 0x3b4   :  { %5047 = vmatmul.mubr.bf16.vlgmr.msra.gmra.mrb[20].mxu0 %v1799_v48  ;;  %v5344_v48 = vld [vmem:[#allocation11] sm:$0xff]  }
 0x3b5   :  { %2166 = vmatpush1.bf16.msra.mxu0 %v5297_v13  ;;  %2197 = vmatprep.mubr.bf16.mxu0 %v5773_v52  ;;  %v5354_v13 = vld [vmem:[#allocation11 + $0x58] sm:$0xff]  }
 0x3b6   :  { %2167 = vmatprep.subr.bf16.mxu0 %v5305_v16  ;;  %v5357_v16 = vld [vmem:[#allocation11 + $0x98] sm:$0xff]  }
 0x3b9   :  { %2168 = vmatpush1.bf16.msra.mxu0 %v5303_v18  ;;  %v5359_v18 = vld [vmem:[#allocation11 + $0xe0] sm:$0xff]  }
 0x3ba   :  { %2169 = vmatprep.subr.bf16.mxu0 %v5311_v20  ;;  %v5361_v20 = vld [vmem:[#allocation11 + $0xa0] sm:$0xff]  }
 0x3bd   :  { %2170 = vmatpush1.bf16.msra.mxu0 %v5309_v22  ;;  %v5363_v22 = vld [vmem:[#allocation11 + $0xe8] sm:$0xff]  }
 0x3be   :  { %2171 = vmatprep.subr.bf16.mxu0 %v5317_v28  ;;  %v5369_v28 = vld [vmem:[#allocation11 + $0xb0] sm:$0xff]  }
 0x3c1   :  { %2172 = vmatpush1.bf16.msra.mxu0 %v5315_v30  ;;  %v5371_v30 = vld [vmem:[#allocation11 + $0xf8] sm:$0xff]  }
 0x3c2   :  { %2173 = vmatprep.subr.bf16.mxu0 %v5323_v32  ;;  %v5373_v32 = vld [vmem:[#allocation11 + $0xb8] sm:$0xff]  }
 0x3c5   :  { %2174 = vmatpush1.bf16.msra.mxu0 %v5321_v35  ;;  %v1672_v35 = vld [vmem:[#allocation16 + $0x10] sm:$0xff] }
 0x3c6   :  { %2175 = vmatprep.subr.bf16.mxu0 %v5329_v37  ;;  %v1673_v37 = vld [vmem:[#allocation16 + $0x18] sm:$0xff] }
 0x3c9   :  { %2176 = vmatpush1.bf16.msra.mxu0 %v5327_v39  ;;  %v1959_v39 = vrot.slane %v1672_v35, %v6094_v34  ;;  %v5383_v35 = vld [vmem:[#allocation8 + $0x48] sm:$0xff]  }
 0x3ca   :  { %2177 = vmatprep.subr.bf16.mxu0 %v5335_v41  ;;  %v1963_v41 = vrot.slane %v1673_v37, %v6094_v34  ;;  %v5385_v37 = vld [vmem:[#allocation8 + $0x58] sm:$0xff]  }
 0x3cd   :  { %2178 = vmatpush1.bf16.msra.mxu0 %v5333_v43 }
 0x3ce   :  { %2179 = vmatprep.subr.bf16.mxu0 %v5341_v50 }
 0x3d1   :  { %2180 = vmatpush1.bf16.msra.mxu0 %v5339_v49 }
 0x3d2   :  { %4892 = vmatprep.subr.bf16.mxu0 %v5343_v54 }
 0x487   :  { %v1886_v5 = vpop.f32.mrb[20].mxu0 }
 0x488   :  { %v1887_v6 = vadd.f32 %v1886_v5, %v1803_v4  ;;  %v5048_v7 = vpop.f32.mrb[21].mxu0  ;;  %v5346_v5 = vld [vmem:[#allocation11 + $0x48] sm:$0xff]  }
 0x489   :  { %v1889_v8 = vpop.f32.mrb[22].mxu0  ;;  %v5348_v7 = vld [vmem:[#allocation11 + $0x8] sm:$0xff]  }
 0x48a   :  { %v5049_v9 = vpop.f32.mrb[23].mxu0  ;;  %v1892_v10 = vadd.f32 %v1887_v6, %v1669_v57  ;;  %v5347_v6 = vld [vmem:[#allocation11 + $0xc8] sm:$0xff]  }
 0x48b   :  { %v5349_v8 = vld [vmem:[#allocation11 + $0x88] sm:$0xff]   ;;  %v5350_v9 = vld [vmem:[#allocation11 + $0x50] sm:$0xff]  }
 0x48c   :  { %1893 = vadd.xlane.f32.xlu0 %v1892_v10 }
 0x519   :  { %v1894_v23 = vpop.xlane.xlu0 %1893 }
 0x51a   :  { %v1896_v24 = vmul.f32 0.0078125, %v1894_v23  ;;  %v5364_v23 = vld [vmem:[#allocation11 + $0x28] sm:$0xff]  }
 0x51c   :  { %v1897_v25 = vsub.f32 %v1892_v10, %v1896_v24  ;;  %v5351_v10 = vld [vmem:[#allocation11 + $0xd0] sm:$0xff]   ;;  %v5365_v24 = vld [vmem:[#allocation11 + $0xa8] sm:$0xff]  }
 0x51e   :  { %v1898_v26 = vmul.f32 %v1897_v25, %v1897_v25 }
 0x520   :  { %1899 = vadd.xlane.f32.xlu0 %v1898_v26  ;;  %v5367_v26 = vld [vmem:[#allocation11 + $0xf0] sm:$0xff]  }
 0x5ad   :  { %v1900_v55 = vpop.xlane.xlu0 %1899 }
 0x5ae   :  { %v1901_v56 = vmul.f32 0.0078125, %v1900_v55 }
 0x5b0   :  { %v1902_v57 = vadd.f32 1e-05, %v1901_v56 }
 0x5b2   :  { %5482 = vrsqrt.f32 %v1902_v57 }
 0x5bc   :  { %v5483_v62 = vpop.eup %5482 }
 0x5bd   :  { %v1904_v63 = vmul.f32 %v5483_v62, %v1897_v25  ;;  %v5366_v25 = vld [vmem:[#allocation11 + $0x70] sm:$0xff]  }
 0x5bf   :  { %v1909_v1 = vmul.f32 %v1908_v60, %v1904_v63 }
 0x5c1   :  { %v6087_v2 = vadd.f32 %v1913_v0, %v1909_v1 }
 0x5c3   :  { %v1947_v4 = vpack.c.bf16 %v6087_v2, %v6087_v2 }
 0x5c5   :  { %2157 = vmatmul.mubr.bf16.vlgmr.msra.gmra.mrb[20].mxu1 %v1947_v4  ;;  %2198 = vmatmul.mubr.bf16.vlgmr.msra.gmra.mrb[24].mxu0 %v1947_v4 }
 0x5c6   :  { %4871 = vmatpush3.bf16.msra.mxu1 %v5344_v48  ;;  %4893 = vmatpush3.bf16.msra.mxu0 %v5345_v3 }
 0x5c7   :  { %4872 = vmatprep.subr.bf16.mxu1 %v5346_v5  ;;  %4894 = vmatprep.subr.bf16.mxu0 %v5347_v6  ;;  %v6106_v6 = vsub.s32 3, %v6042_v45 }
 0x5ca   :  { %4873 = vmatpush3.bf16.msra.mxu1 %v5348_v7  ;;  %4895 = vmatpush3.bf16.msra.mxu0 %v5349_v8 }
 0x5cb   :  { %4874 = vmatprep.subr.bf16.mxu1 %v5350_v9  ;;  %4896 = vmatprep.subr.bf16.mxu0 %v5351_v10  ;;  %v2281_v9 = vrot.slane %v6070_v61, %v6106_v6 }
 0x5ce   :  { %4875 = vmatpush3.bf16.msra.mxu1 %v5352_v11  ;;  %4897 = vmatpush3.bf16.msra.mxu0 %v5353_v12 }
 0x5cf   :  { %4876 = vmatprep.subr.bf16.mxu1 %v5354_v13  ;;  %4898 = vmatprep.subr.bf16.mxu0 %v5355_v14 }
 0x5d2   :  { %4877 = vmatpush3.bf16.msra.mxu1 %v5356_v15  ;;  %4899 = vmatpush3.bf16.msra.mxu0 %v5357_v16 }
 0x5d3   :  { %4878 = vmatprep.subr.bf16.mxu1 %v5358_v17  ;;  %4900 = vmatprep.subr.bf16.mxu0 %v5359_v18 }
 0x5d6   :  { %4879 = vmatpush3.bf16.msra.mxu1 %v5360_v19  ;;  %4901 = vmatpush3.bf16.msra.mxu0 %v5361_v20 }
 0x5d7   :  { %4880 = vmatprep.subr.bf16.mxu1 %v5362_v21  ;;  %4902 = vmatprep.subr.bf16.mxu0 %v5363_v22  ;;  %v5374_v21 = vld [vmem:[#allocation7 + $0x40] sm:$0xff]   ;;  %v5375_v22 = vld [vmem:[#allocation7 + $0x48] sm:$0xff]  }
 0x5da   :  { %4881 = vmatpush3.bf16.msra.mxu1 %v5364_v23  ;;  %4903 = vmatpush3.bf16.msra.mxu0 %v5365_v24 }
 0x5db   :  { %4882 = vmatprep.subr.bf16.mxu1 %v5366_v25  ;;  %4904 = vmatprep.subr.bf16.mxu0 %v5367_v26 }
 0x5de   :  { %4883 = vmatpush3.bf16.msra.mxu1 %v5368_v27  ;;  %4905 = vmatpush3.bf16.msra.mxu0 %v5369_v28  ;;  %v5376_v27 = vld [vmem:[#allocation7 + $0x50] sm:$0xff]   ;;  %v5377_v28 = vld [vmem:[#allocation7 + $0x58] sm:$0xff]  }
 0x5df   :  { %4884 = vmatprep.subr.bf16.mxu1 %v5370_v29  ;;  %4906 = vmatprep.subr.bf16.mxu0 %v5371_v30  ;;  %v5379_v29 = vld [vmem:[#allocation7 + $0x68] sm:$0xff]   ;;  %v5380_v30 = vld [vmem:[#allocation7 + $0x70] sm:$0xff]  }
 0x5e2   :  { %4885 = vmatpush3.bf16.msra.mxu1 %v5372_v31  ;;  %4907 = vmatpush3.bf16.msra.mxu0 %v5373_v32  ;;  %v5381_v31 = vld [vmem:[#allocation7 + $0x78] sm:$0xff]   ;;  %v5382_v32 = vld [vmem:[#allocation8 + $0x40] sm:$0xff]  }
 0x5e3   :  { %5050 = vmatprep.subr.bf16.mxu1 %v5771_v33  ;;  %5070 = vmatprep.subr.bf16.mxu0 %v5771_v33 }
 0x698   :  { %v2158_v42 = vpop.f32.mrb[20].mxu1  ;;  %v2199_v43 = vpop.f32.mrb[24].mxu0 }
 0x699   :  { %v2159_v44 = vadd.f32 %v2158_v42, %v1951_v38  ;;  %v2200_v46 = vadd.f32 %v2199_v43, %v1959_v39  ;;  %v2160_v49 = vpop.f32.mrb[21].mxu1  ;;  %v2201_v50 = vpop.f32.mrb[25].mxu0  ;;  %v5386_v38 = vld [vmem:[#allocation8 + $0x60] sm:$0xff]   ;;  %v5387_v39 = vld [vmem:[#allocation8 + $0x68] sm:$0xff]  }
 0x69a   :  { %v2161_v53 = vadd.f32 %v2160_v49, %v1955_v40  ;;  %v2202_v54 = vadd.f32 %v2201_v50, %v1963_v41  ;;  %v2162_v55 = vpop.f32.mrb[22].mxu1  ;;  %v2203_v56 = vpop.f32.mrb[26].mxu0  ;;  %v5388_v40 = vld [vmem:[#allocation8 + $0x70] sm:$0xff]  }
 0x69b   :  { %v2206_v57 = vmax.f32 %v2159_v44, 0.0  ;;  %v2208_v60 = vmax.f32 %v2200_v46, 0.0  ;;  %v2163_v62 = vpop.f32.mrb[23].mxu1  ;;  %v2204_v63 = vpop.f32.mrb[27].mxu0  ;;  %v2568_v44 = vsub.s32 6, %v6042_v45  ;;  %v2573_v46 = vsub.s32 7, %v6042_v45 }
 0x69c   :  { %v2207_v0 = vmax.f32 %v2161_v53, 0.0  ;;  %v2209_v1 = vmax.f32 %v2202_v54, 0.0  ;;  %v6134_v62 = vld [vmem:[#allocation16 + $0x20] sm:$0xff] }
 0x69d   :  { %v2274_v4 = vpack.c.bf16 %v2206_v57, %v2206_v57  ;;  %v2276_v5 = vpack.c.bf16 %v2208_v60, %v2208_v60  ;;  %v2569_v49 = vrot.slane %v6070_v61, %v2568_v44  ;;  %v2574_v54 = vrot.slane %v6070_v61, %v2573_v46  ;;  %v5389_v60 = vld [vmem:[#allocation8 + $0x78] sm:$0xff]   ;;  %v3678_v45 = vld [vmem:[#allocation13] sm:$0xff] }
 0x69e   :  { %v2275_v48 = vpack.c.bf16 %v2207_v0, %v2207_v0  ;;  %v2277_v3 = vpack.c.bf16 %v2209_v1, %v2209_v1  ;;  %v2602_v63 = vrot.slane %v6134_v62, %v6046_v47  ;;  %v2712_v61 = vrot.slane %v6134_v62, %v6066_v51  ;;  %v5390_v47 = vld [vmem:[#allocation10 + $0x100] ss:$16 sps:$4 sm:$0xff]   ;;  %v5399_v51 = vld [vmem:[#allocation10 + $0x128] ss:$16 sps:$4 sm:$0xff]  }
 0x6a0   :  { %2506 = vmatprep.mubr.bf16.mxu1 %v2275_v48  ;;  %2546 = vmatprep.mubr.bf16.mxu0 %v2277_v3 }
 0x6a1   :  { %2507 = vmatmul.mubr.bf16.vlgmr.msra.gmra.mrb[24].mxu1 %v2274_v4  ;;  %2547 = vmatmul.mubr.bf16.vlgmr.msra.gmra.mrb[28].mxu0 %v2276_v5 }
 0x6a2   :  { %5066 = vmatprep.mubr.msk.bf16.mxu1 %vm5772_vm0, %v5771_v33  ;;  %5086 = vmatprep.mubr.msk.bf16.mxu0 %vm5772_vm0, %v5771_v33 }
 0x6a3   :  { %5051 = vmatpush3.bf16.msra.mxu1 %v5374_v21  ;;  %5071 = vmatpush3.bf16.msra.mxu0 %v5382_v32  ;;  %v5402_v21 = vld [vmem:[#allocation10 + $0x140] ss:$16 sps:$4 sm:$0xff]  }
 0x6a4   :  { %5052 = vmatprep.subr.bf16.mxu1 %v5771_v33  ;;  %5072 = vmatprep.subr.bf16.mxu0 %v5771_v33  ;;  %v5414_v32 = vld [vmem:[#allocation10 + $0x180] ss:$16 sps:$4 sm:$0xff]  }
 0x6a7   :  { %5053 = vmatpush3.bf16.msra.mxu1 %v5375_v22  ;;  %5073 = vmatpush3.bf16.msra.mxu0 %v5383_v35  ;;  %v5405_v22 = vld [vmem:[#allocation10 + $0x148] ss:$16 sps:$4 sm:$0xff]  }
 0x6a8   :  { %5054 = vmatprep.subr.bf16.mxu1 %v5771_v33  ;;  %5074 = vmatprep.subr.bf16.mxu0 %v5771_v33  ;;  %v5417_v35 = vld [vmem:[#allocation10 + $0x188] ss:$16 sps:$4 sm:$0xff]  }
 0x6ab   :  { %5055 = vmatpush3.bf16.msra.mxu1 %v5376_v27  ;;  %5075 = vmatpush3.bf16.msra.mxu0 %v5384_v36  ;;  %v5410_v27 = vld [vmem:[#allocation10 + $0x164] ss:$16 sps:$4 sm:$0xff]  }
 0x6ac   :  { %5056 = vmatprep.subr.bf16.mxu1 %v5771_v33  ;;  %5076 = vmatprep.subr.bf16.mxu0 %v5771_v33  ;;  %v5422_v36 = vld [vmem:[#allocation10 + $0x1a4] ss:$16 sps:$4 sm:$0xff]  }
 0x6af   :  { %5057 = vmatpush3.bf16.msra.mxu1 %v5377_v28  ;;  %5077 = vmatpush3.bf16.msra.mxu0 %v5385_v37  ;;  %v5413_v28 = vld [vmem:[#allocation10 + $0x16c] ss:$16 sps:$4 sm:$0xff]  }
 0x6b0   :  { %5058 = vmatprep.subr.bf16.mxu1 %v5771_v33  ;;  %5078 = vmatprep.subr.bf16.mxu0 %v5771_v33  ;;  %v5425_v37 = vld [vmem:[#allocation10 + $0x1ac] ss:$16 sps:$4 sm:$0xff]  }
 0x6b3   :  { %5079 = vmatpush3.bf16.msra.mxu0 %v5386_v38  ;;  %v5420_v38 = vld [vmem:[#allocation10 + $0x1a0] ss:$16 sps:$4 sm:$0xff]  }
 0x6b4   :  { %5080 = vmatprep.subr.bf16.mxu0 %v5771_v33 }
 0x6b7   :  { %5081 = vmatpush3.bf16.msra.mxu0 %v5387_v39  ;;  %v5423_v39 = vld [vmem:[#allocation10 + $0x1a8] ss:$16 sps:$4 sm:$0xff]  }
 0x6b8   :  { %5082 = vmatprep.subr.bf16.mxu0 %v5771_v33 }
 0x6bb   :  { %5083 = vmatpush3.bf16.msra.mxu0 %v5388_v40  ;;  %v5428_v40 = vld [vmem:[#allocation10 + $0x1c4] ss:$16 sps:$4 sm:$0xff]  }
 0x6bc   :  { %5084 = vmatprep.subr.bf16.mxu0 %v5771_v33 }
 0x6bf   :  { %5085 = vmatpush3.bf16.msra.mxu0 %v5389_v60 }
 0x774   :  { %v4886_v7 = vpop.f32.mrb[24].mxu1  ;;  %v4908_v8 = vpop.f32.mrb[28].mxu0 }
 0x775   :  { %v4887_v10 = vpop.f32.mrb[25].mxu1  ;;  %v4909_v11 = vpop.f32.mrb[29].mxu0 }
 0x776   :  { %v4888_v12 = vadd.f32 %v4887_v10, %v4886_v7  ;;  %v4910_v13 = vadd.f32 %v4909_v11, %v4908_v8  ;;  %v4889_v14 = vpop.f32.mrb[26].mxu1  ;;  %v4911_v15 = vpop.f32.mrb[30].mxu0 }
 0x777   :  { %v4890_v16 = vpop.f32.mrb[27].mxu1  ;;  %v4912_v17 = vpop.f32.mrb[31].mxu0  ;;  %v5393_v14 = vld [vmem:[#allocation10 + $0x108] ss:$16 sps:$4 sm:$0xff]   ;;  %v5395_v15 = vld [vmem:[#allocation10 + $0x10c] ss:$16 sps:$4 sm:$0xff]  }
 0x778   :  { %v2509_v18 = vadd.f32 %v4888_v12, %v2281_v9  ;;  %v5398_v16 = vld [vmem:[#allocation10 + $0x124] ss:$16 sps:$4 sm:$0xff]   ;;  %v5401_v17 = vld [vmem:[#allocation10 + $0x12c] ss:$16 sps:$4 sm:$0xff]   ;;  %3074 = vmatprep.subr.bf16.mxu0 %v5395_v15 }
 0x779   :  { %v5450_v15 = vld [vmem:[#allocation11 + $0x158] sm:$0xff]  }
 0x77a   :  { %v2549_v19 = vadd.f32 %v4910_v13, %v2509_v18  ;;  %v5392_v13 = vld [vmem:[#allocation10 + $0x104] ss:$16 sps:$4 sm:$0xff]   ;;  %v5396_v18 = vld [vmem:[#allocation10 + $0x120] ss:$16 sps:$4 sm:$0xff]  }
 0x77c   :  { %v2554_v20 = vadd.f32 %v2549_v19, %v6087_v2  ;;  %v5378_v2 = vld [vmem:[#allocation7 + $0x60] sm:$0xff]  }
 0x77d   :  { %5059 = vmatpush3.bf16.msra.mxu1 %v5378_v2  ;;  %v5404_v19 = vld [vmem:[#allocation10 + $0x144] ss:$16 sps:$4 sm:$0xff]   ;;  %v5408_v2 = vld [vmem:[#allocation10 + $0x160] ss:$16 sps:$4 sm:$0xff]  }
 0x77e   :  { %2555 = vadd.xlane.f32.xlu1 %v2554_v20  ;;  %5060 = vmatprep.subr.bf16.mxu1 %v5771_v33 }
 0x781   :  { %5061 = vmatpush3.bf16.msra.mxu1 %v5379_v29  ;;  %v5411_v29 = vld [vmem:[#allocation10 + $0x168] ss:$16 sps:$4 sm:$0xff]  }
 0x782   :  { %5062 = vmatprep.subr.bf16.mxu1 %v5771_v33 }
 0x785   :  { %5063 = vmatpush3.bf16.msra.mxu1 %v5380_v30  ;;  %v5416_v30 = vld [vmem:[#allocation10 + $0x184] ss:$16 sps:$4 sm:$0xff]  }
 0x786   :  { %5064 = vmatprep.subr.bf16.mxu1 %v5771_v33 }
 0x789   :  { %5065 = vmatpush3.bf16.msra.mxu1 %v5381_v31  ;;  %v5419_v31 = vld [vmem:[#allocation10 + $0x18c] ss:$16 sps:$4 sm:$0xff]  }
 0x78a   :  { %3033 = vmatprep.subr.bf16.mxu1 %v5392_v13  ;;  %v5448_v13 = vld [vmem:[#allocation11 + $0x110] sm:$0xff]  }
 0x80b   :  { %v2556_v23 = vpop.xlane.xlu1 %2555 }
 0x80c   :  { %v2557_v24 = vmul.f32 0.0078125, %v2556_v23 }
 0x80e   :  { %v2558_v25 = vsub.f32 %v2554_v20, %v2557_v24  ;;  %v5407_v20 = vld [vmem:[#allocation10 + $0x14c] ss:$16 sps:$4 sm:$0xff]  }
 0x810   :  { %v2559_v26 = vmul.f32 %v2558_v25, %v2558_v25 }
 0x812   :  { %2560 = vadd.xlane.f32.xlu1 %v2559_v26 }
 0x89f   :  { %v2561_v41 = vpop.xlane.xlu1 %2560 }
 0x8a0   :  { %v2562_v42 = vmul.f32 0.0078125, %v2561_v41  ;;  %v5431_v41 = vld [vmem:[#allocation10 + $0x1cc] ss:$16 sps:$4 sm:$0xff]  }
 0x8a2   :  { %v2563_v43 = vadd.f32 1e-05, %v2562_v42  ;;  %v5426_v42 = vld [vmem:[#allocation10 + $0x1c0] ss:$16 sps:$4 sm:$0xff]  }
 0x8a4   :  { %5484 = vrsqrt.f32 %v2563_v43  ;;  %v5429_v43 = vld [vmem:[#allocation10 + $0x1c8] ss:$16 sps:$4 sm:$0xff]  }
 0x8ae   :  { %v5485_v50 = vpop.eup %5484 }
 0x8af   :  { %v2565_v53 = vmul.f32 %v5485_v50, %v2558_v25  ;;  %v5432_v50 = vld [vmem:[#allocation10 + $0x1e0] ss:$16 sps:$4 sm:$0xff]  }
 0x8b1   :  { %v2570_v55 = vmul.f32 %v2569_v49, %v2565_v53  ;;  %v5434_v49 = vld [vmem:[#allocation10 + $0x1e4] ss:$16 sps:$4 sm:$0xff]   ;;  %v5435_v53 = vld [vmem:[#allocation10 + $0x1e8] ss:$16 sps:$4 sm:$0xff]  }
 0x8b3   :  { %v2575_v56 = vadd.f32 %v2574_v54, %v2570_v55  ;;  %v5437_v54 = vld [vmem:[#allocation10 + $0x1ec] ss:$16 sps:$4 sm:$0xff]   ;;  %v5438_v55 = vld [vmem:[#allocation11 + $0x140] sm:$0xff]  }
 0x8b5   :  { %v2598_v57 = vpack.c.bf16 %v2575_v56, %v2575_v56 }
 0x8b7   :  { %5067 = vmatmul.mubr.bf16.vlgmr.msra.gmra.mrb[28].mxu1 %v2598_v57 }
 0x8b8   :  { %3065 = vmatprep.mubr.bf16.mxu1 %v5773_v52  ;;  %3034 = vmatpush1.bf16.msra.mxu1 %v5390_v47  ;;  %v5446_v47 = vld [vmem:[#allocation11 + $0x150] sm:$0xff]  }
 0x8b9   :  { %3035 = vmatprep.subr.bf16.mxu1 %v5398_v16  ;;  %v5451_v16 = vld [vmem:[#allocation11 + $0x1d8] sm:$0xff]  }
 0x8bc   :  { %3036 = vmatpush1.bf16.msra.mxu1 %v5396_v18  ;;  %v5453_v18 = vld [vmem:[#allocation11 + $0x198] sm:$0xff]  }
 0x8bd   :  { %3037 = vmatprep.subr.bf16.mxu1 %v5404_v19  ;;  %v5455_v19 = vld [vmem:[#allocation11 + $0x1e0] sm:$0xff]  }
 0x8c0   :  { %3038 = vmatpush1.bf16.msra.mxu1 %v5402_v21  ;;  %v5457_v21 = vld [vmem:[#allocation11 + $0x1a0] sm:$0xff]  }
 0x8c1   :  { %3039 = vmatprep.subr.bf16.mxu1 %v5410_v27  ;;  %v5463_v27 = vld [vmem:[#allocation11 + $0x1f0] sm:$0xff]  }
 0x8c4   :  { %3040 = vmatpush1.bf16.msra.mxu1 %v5408_v2  ;;  %v5465_v2 = vld [vmem:[#allocation11 + $0x1b0] sm:$0xff]  }
 0x8c5   :  { %3041 = vmatprep.subr.bf16.mxu1 %v5416_v30  ;;  %v5467_v30 = vld [vmem:[#allocation11 + $0x1f8] sm:$0xff]  }
 0x8c8   :  { %3042 = vmatpush1.bf16.msra.mxu1 %v5414_v32  ;;  %v5469_v32 = vld [vmem:[#allocation11 + $0x1b8] sm:$0xff]  }
 0x8c9   :  { %3043 = vmatprep.subr.bf16.mxu1 %v5422_v36  ;;  %v2578_v36 = vld [vmem:[#allocation16 + $0x28] sm:$0xff] }
 0x8cc   :  { %3044 = vmatpush1.bf16.msra.mxu1 %v5420_v38  ;;  %v2860_v38 = vrot.slane %v6134_v62, %v6094_v34 }
 0x8cd   :  { %3045 = vmatprep.subr.bf16.mxu1 %v5428_v40  ;;  %v2864_v40 = vrot.slane %v2578_v36, %v6094_v34 }
 0x8d0   :  { %3046 = vmatpush1.bf16.msra.mxu1 %v5426_v42 }
 0x8d1   :  { %3047 = vmatprep.subr.bf16.mxu1 %v5434_v49 }
 0x8d4   :  { %3048 = vmatpush1.bf16.msra.mxu1 %v5432_v50 }
 0x8d5   :  { %4932 = vmatprep.subr.bf16.mxu1 %v5438_v55 }
 0x98a   :  { %v2685_v0 = vpop.f32.mrb[28].mxu1 }
 0x98b   :  { %v2686_v1 = vadd.f32 %v2685_v0, %v2602_v63  ;;  %v5068_v48 = vpop.f32.mrb[29].mxu1  ;;  %v2816_v0 = vrot.slane %v6134_v62, %v6079_v58 }
 0x98c   :  { %v2688_v3 = vpop.f32.mrb[30].mxu1 }
 0x98d   :  { %v2708_v4 = vpack.c.bf16 %v2686_v1, %v2686_v1  ;;  %v5069_v5 = vpop.f32.mrb[31].mxu1  ;;  %v2821_v3 = vrot.slane %v6134_v62, %v1912_v59  ;;  %v5447_v59 = vld [vmem:[#allocation11 + $0x1d0] sm:$0xff]  }
 0x98f   :  { %5087 = vmatmul.mubr.bf16.vlgmr.msra.gmra.mrb[32].mxu0 %v2708_v4 }
 0x990   :  { %3106 = vmatprep.mubr.bf16.mxu0 %v5773_v52  ;;  %3075 = vmatpush1.bf16.msra.mxu0 %v5393_v14  ;;  %v5449_v14 = vld [vmem:[#allocation11 + $0x190] sm:$0xff]  }
 0x991   :  { %3076 = vmatprep.subr.bf16.mxu0 %v5401_v17  ;;  %v5452_v17 = vld [vmem:[#allocation11 + $0x118] sm:$0xff]  }
 0x994   :  { %3077 = vmatpush1.bf16.msra.mxu0 %v5399_v51  ;;  %v5454_v51 = vld [vmem:[#allocation11 + $0x160] sm:$0xff]  }
 0x995   :  { %3078 = vmatprep.subr.bf16.mxu0 %v5407_v20  ;;  %v5456_v20 = vld [vmem:[#allocation11 + $0x120] sm:$0xff]  }
 0x998   :  { %3079 = vmatpush1.bf16.msra.mxu0 %v5405_v22  ;;  %v5458_v22 = vld [vmem:[#allocation11 + $0x168] sm:$0xff]  }
 0x999   :  { %3080 = vmatprep.subr.bf16.mxu0 %v5413_v28  ;;  %v5464_v28 = vld [vmem:[#allocation11 + $0x130] sm:$0xff]  }
 0x99c   :  { %3081 = vmatpush1.bf16.msra.mxu0 %v5411_v29  ;;  %v5466_v29 = vld [vmem:[#allocation11 + $0x178] sm:$0xff]  }
 0x99d   :  { %3082 = vmatprep.subr.bf16.mxu0 %v5419_v31  ;;  %v5468_v31 = vld [vmem:[#allocation11 + $0x138] sm:$0xff]  }
 0x9a0   :  { %3083 = vmatpush1.bf16.msra.mxu0 %v5417_v35  ;;  %v2579_v35 = vld [vmem:[#allocation16 + $0x30] sm:$0xff] }
 0x9a1   :  { %3084 = vmatprep.subr.bf16.mxu0 %v5425_v37  ;;  %v2580_v37 = vld [vmem:[#allocation16 + $0x38] sm:$0xff] }
 0x9a4   :  { %3085 = vmatpush1.bf16.msra.mxu0 %v5423_v39  ;;  %v2868_v39 = vrot.slane %v2579_v35, %v6094_v34 }
 0x9a5   :  { %3086 = vmatprep.subr.bf16.mxu0 %v5431_v41  ;;  %v2872_v41 = vrot.slane %v2580_v37, %v6094_v34 }
 0x9a8   :  { %3087 = vmatpush1.bf16.msra.mxu0 %v5429_v43 }
 0x9a9   :  { %3088 = vmatprep.subr.bf16.mxu0 %v5437_v54 }
 0x9ac   :  { %3089 = vmatpush1.bf16.msra.mxu0 %v5435_v53 }
 0xa62   :  { %v2795_v7 = vpop.f32.mrb[32].mxu0 }
 0xa63   :  { %v2796_v8 = vadd.f32 %v2795_v7, %v2712_v61  ;;  %v5088_v9 = vpop.f32.mrb[33].mxu0  ;;  %v5440_v61 = vld [vmem:[#allocation11 + $0x100] sm:$0xff]  }
 0xa64   :  { %v2798_v10 = vpop.f32.mrb[34].mxu0  ;;  %v5441_v7 = vld [vmem:[#allocation11 + $0x180] sm:$0xff]   ;;  %v5442_v9 = vld [vmem:[#allocation11 + $0x148] sm:$0xff]  }
 0xa65   :  { %v5089_v11 = vpop.f32.mrb[35].mxu0  ;;  %v2801_v12 = vadd.f32 %v2796_v8, %v2575_v56  ;;  %v5439_v56 = vld [vmem:[#allocation11 + $0x1c0] sm:$0xff]   ;;  %v5443_v10 = vld [vmem:[#allocation11 + $0x1c8] sm:$0xff]  }
 0xa66   :  { %4954 = vmatprep.subr.bf16.mxu0 %v5439_v56  ;;  %v5444_v11 = vld [vmem:[#allocation11 + $0x108] sm:$0xff]  }
 0xa67   :  { %2802 = vadd.xlane.f32.xlu0 %v2801_v12 }
 0xaf4   :  { %v2803_v23 = vpop.xlane.xlu0 %2802 }
 0xaf5   :  { %v2804_v24 = vmul.f32 0.0078125, %v2803_v23  ;;  %v5459_v23 = vld [vmem:[#allocation11 + $0x1e8] sm:$0xff]  }
 0xaf7   :  { %v2805_v25 = vsub.f32 %v2801_v12, %v2804_v24  ;;  %v5445_v12 = vld [vmem:[#allocation11 + $0x188] sm:$0xff]  }
 0xaf8   :  { %v5460_v24 = vld [vmem:[#allocation11 + $0x128] sm:$0xff]  }
 0xaf9   :  { %v2806_v26 = vmul.f32 %v2805_v25, %v2805_v25 }
 0xafb   :  { %2807 = vadd.xlane.f32.xlu1 %v2806_v26  ;;  %v5462_v26 = vld [vmem:[#allocation11 + $0x170] sm:$0xff]  }
 0xb88   :  { %v2808_v57 = vpop.xlane.xlu1 %2807 }
 0xb89   :  { %v2809_v60 = vmul.f32 0.0078125, %v2808_v57 }
 0xb8b   :  { %v2810_v63 = vadd.f32 1e-05, %v2809_v60 }
 0xb8d   :  { %5486 = vrsqrt.f32 %v2810_v63 }
 0xb97   :  { %v5487_v1 = vpop.eup %5486 }
 0xb98   :  { %v2812_v48 = vmul.f32 %v5487_v1, %v2805_v25  ;;  %v5461_v25 = vld [vmem:[#allocation11 + $0x1a8] sm:$0xff]  }
 0xb9a   :  { %v2817_v4 = vmul.f32 %v2816_v0, %v2812_v48 }
 0xb9c   :  { %v6146_v5 = vadd.f32 %v2821_v3, %v2817_v4 }
 0xb9e   :  { %v2856_v8 = vpack.c.bf16 %v6146_v5, %v6146_v5 }
 0xba0   :  { %3066 = vmatmul.mubr.bf16.vlgmr.msra.gmra.mrb[32].mxu1 %v2856_v8  ;;  %3107 = vmatmul.mubr.bf16.vlgmr.msra.gmra.mrb[36].mxu0 %v2856_v8 }
 0xba1   :  { %4933 = vmatpush3.bf16.msra.mxu1 %v5440_v61  ;;  %4955 = vmatpush3.bf16.msra.mxu0 %v5441_v7 }
 0xba2   :  { %4934 = vmatprep.subr.bf16.mxu1 %v5442_v9  ;;  %4956 = vmatprep.subr.bf16.mxu0 %v5443_v10 }
 0xba5   :  { %4935 = vmatpush3.bf16.msra.mxu1 %v5444_v11  ;;  %4957 = vmatpush3.bf16.msra.mxu0 %v5445_v12  ;;  %v3191_v12 = vrot.slane %v6134_v62, %v6106_v6 }
 0xba6   :  { %4936 = vmatprep.subr.bf16.mxu1 %v5446_v47  ;;  %4958 = vmatprep.subr.bf16.mxu0 %v5447_v59 }
 0xba9   :  { %4937 = vmatpush3.bf16.msra.mxu1 %v5448_v13  ;;  %4959 = vmatpush3.bf16.msra.mxu0 %v5449_v14 }
 0xbaa   :  { %4938 = vmatprep.subr.bf16.mxu1 %v5450_v15  ;;  %4960 = vmatprep.subr.bf16.mxu0 %v5451_v16 }
 0xbad   :  { %4939 = vmatpush3.bf16.msra.mxu1 %v5452_v17  ;;  %4961 = vmatpush3.bf16.msra.mxu0 %v5453_v18 }
 0xbae   :  { %4940 = vmatprep.subr.bf16.mxu1 %v5454_v51  ;;  %4962 = vmatprep.subr.bf16.mxu0 %v5455_v19 }
 0xbb1   :  { %4941 = vmatpush3.bf16.msra.mxu1 %v5456_v20  ;;  %4963 = vmatpush3.bf16.msra.mxu0 %v5457_v21  ;;  %v5470_v21 = vld [vmem:[%s6284_s7] sm:$0xff]  }
 0xbb2   :  { %4942 = vmatprep.subr.bf16.mxu1 %v5458_v22  ;;  %4964 = vmatprep.subr.bf16.mxu0 %v5459_v23  ;;  %v5471_v22 = vld [vmem:[%s6284_s7 + $0x8] sm:$0xff]  }
 0xbb5   :  { %4943 = vmatpush3.bf16.msra.mxu1 %v5460_v24  ;;  %4965 = vmatpush3.bf16.msra.mxu0 %v5461_v25 }
 0xbb6   :  { %4944 = vmatprep.subr.bf16.mxu1 %v5462_v26  ;;  %4966 = vmatprep.subr.bf16.mxu0 %v5463_v27  ;;  %v5473_v27 = vld [vmem:[%s6284_s7 + $0x18] sm:$0xff]  }
 0xbb9   :  { %4945 = vmatpush3.bf16.msra.mxu1 %v5464_v28  ;;  %4967 = vmatpush3.bf16.msra.mxu0 %v5465_v2  ;;  %v5474_v28 = vld [vmem:[%s6284_s7 + $0x20] sm:$0xff]   ;;  %v5475_v2 = vld [vmem:[%s6284_s7 + $0x28] sm:$0xff]  }
 0xbba   :  { %4946 = vmatprep.subr.bf16.mxu1 %v5466_v29  ;;  %4968 = vmatprep.subr.bf16.mxu0 %v5467_v30  ;;  %v5476_v29 = vld [vmem:[%s6284_s7 + $0x30] sm:$0xff]   ;;  %v5477_v30 = vld [vmem:[%s6284_s7 + $0x38] sm:$0xff]  }
 0xbbd   :  { %4947 = vmatpush3.bf16.msra.mxu1 %v5468_v31  ;;  %4969 = vmatpush3.bf16.msra.mxu0 %v5469_v32  ;;  %v5478_v31 = vld [vmem:[%s6285_s8] sm:$0xff]   ;;  %v5479_v32 = vld [vmem:[%s6285_s8 + $0x8] sm:$0xff]  }
 0xbbe   :  { %5090 = vmatprep.subr.bf16.mxu1 %v5771_v33  ;;  %5110 = vmatprep.subr.bf16.mxu0 %v5771_v33 }
 0xc73   :  { %v3067_v42 = vpop.f32.mrb[32].mxu1  ;;  %v3108_v43 = vpop.f32.mrb[36].mxu0 }
 0xc74   :  { %v3068_v49 = vadd.f32 %v3067_v42, %v2860_v38  ;;  %v3109_v50 = vadd.f32 %v3108_v43, %v2868_v39  ;;  %v3069_v53 = vpop.f32.mrb[33].mxu1  ;;  %v3110_v54 = vpop.f32.mrb[37].mxu0  ;;  %v3479_v38 = vrot.slane %v6134_v62, %v2568_v44  ;;  %v5481_v44 = vld [vmem:[%s6285_s8 + $0x18] sm:$0xff]  }
 0xc75   :  { %v3070_v55 = vadd.f32 %v3069_v53, %v2864_v40  ;;  %v3111_v56 = vadd.f32 %v3110_v54, %v2872_v41  ;;  %v3071_v57 = vpop.f32.mrb[34].mxu1  ;;  %v3112_v60 = vpop.f32.mrb[38].mxu0  ;;  %v3484_v41 = vrot.slane %v6134_v62, %v2573_v46  ;;  %v3686_v46 = vld [vmem:[#allocation13 + $0x40] sm:$0xff]  ;;  %v3680_v62 = vld [vmem:[#allocation13 + $0x10] sm:$0xff] }
 0xc76   :  { %v3115_v63 = vmax.f32 %v3068_v49, 0.0  ;;  %v3117_v0 = vmax.f32 %v3109_v50, 0.0  ;;  %v3072_v1 = vpop.f32.mrb[35].mxu1  ;;  %v3113_v48 = vpop.f32.mrb[39].mxu0  ;;  %v5480_v50 = vld [vmem:[%s6285_s8 + $0x10] sm:$0xff]   ;;  %v4627_v53 = vcombine.low %v3678_v45, %v3686_v46  ;;  %v4628_v54 = vcombine.high %v3678_v45, %v3686_v46  ;;  %v6217_v60 = vld [vmem:[#allocation14] sm:$0xff] }
 0xc77   :  { %v3116_v3 = vmax.f32 %v3070_v55, 0.0  ;;  %v3118_v4 = vmax.f32 %v3111_v56, 0.0  ;;  %v3688_v55 = vld [vmem:[#allocation13 + $0x50] sm:$0xff]  ;;  %v3683_v46 = vld [vmem:[#allocation13 + $0x28] sm:$0xff]  ;;  %s5774_s8 = smov [#allocation17]  }
 0xc78   :  { %v3184_v8 = vpack.c.bf16 %v3115_v63, %v3115_v63  ;;  %v3186_v9 = vpack.c.bf16 %v3117_v0, %v3117_v0  ;;  %v4631_v56 = vcombine.low %v3680_v62, %v3688_v55  ;;  %v4632_v57 = vcombine.high %v3680_v62, %v3688_v55  ;;  %v3691_v62 = vld [vmem:[#allocation13 + $0x68] sm:$0xff]  ;;  %s4305_s11 = sshll.u32 %s5774_s8, 4  ;;  %s4306_s11 = int_to_ptr.vmem [resolvable:$true] %s4305_s11 }
 0xc79   :  { %v3185_v61 = vpack.c.bf16 %v3116_v3, %v3116_v3  ;;  %v3187_v7 = vpack.c.bf16 %v3118_v4, %v3118_v4  ;;  %v4638_v55 = vcombine.high %v3683_v46, %v3691_v62  ;;  %s5721_s17 = scalar_lea.vmem %s4306_s11, 2048  ;;  %p5726_p3 = scmp.lt.s32.totalorder %s4306_s11, %s4306_s11 }
 0xc7a   :  { %p5722_p2 = scmp.ne.s32.totalorder %s4306_s11, %s5721_s17  ;;  %p5727_p4 = scmp.lt.s32.totalorder %s5721_s17, %s5721_s17 }
 0xc7b   :  { %3416 = vmatprep.mubr.bf16.mxu1 %v3185_v61  ;;  %3456 = vmatprep.mubr.bf16.mxu0 %v3187_v7  ;;  %v3694_v7 = vld [vmem:[#allocation13 + $0x80] sm:$0xff] }
 0xc7c   :  { %3417 = vmatmul.mubr.bf16.vlgmr.msra.gmra.mrb[36].mxu1 %v3184_v8  ;;  %3457 = vmatmul.mubr.bf16.vlgmr.msra.gmra.mrb[40].mxu0 %v3186_v9  ;;  %v3702_v8 = vld [vmem:[#allocation13 + $0xc0] sm:$0xff]  ;;  %v3696_v9 = vld [vmem:[#allocation13 + $0x90] sm:$0xff]  ;;  %p5728_p5 = por %p5727_p4, %p5726_p3 }
 0xc7d   :  { %5106 = vmatprep.mubr.msk.bf16.mxu1 %vm5772_vm0, %v5771_v33  ;;  %5118 = vmatprep.mubr.msk.bf16.mxu0 %vm5772_vm0, %v5771_v33 }
 0xc7e   :  { %5091 = vmatpush3.bf16.msra.mxu1 %v5470_v21  ;;  %5111 = vmatpush3.bf16.msra.mxu0 %v5478_v31  ;;  %v3681_v31 = vld [vmem:[#allocation13 + $0x18] sm:$0xff]  ;;  %p5729_p6 = pnand %p5728_p5, %p5722_p2 }
 0xc7f   :  { %5092 = vmatprep.subr.bf16.mxu1 %v5771_v33  ;;  %5112 = vmatprep.subr.bf16.mxu0 %v5771_v33 }
 0xc82   :  { %5093 = vmatpush3.bf16.msra.mxu1 %v5471_v22  ;;  %5113 = vmatpush3.bf16.msra.mxu0 %v5479_v32  ;;  %v3689_v32 = vld [vmem:[#allocation13 + $0x58] sm:$0xff] }
 0xc83   :  { %5094 = vmatprep.subr.bf16.mxu1 %v5771_v33  ;;  %5114 = vmatprep.subr.bf16.mxu0 %v5771_v33 }
 0xc86   :  { %5115 = vmatpush3.bf16.msra.mxu0 %v5480_v50 }
 0xc87   :  { %5116 = vmatprep.subr.bf16.mxu0 %v5771_v33 }
 0xc8a   :  { %5117 = vmatpush3.bf16.msra.mxu0 %v5481_v44 }
 0xc8b   :  { %4021 = vmatprep.subr.bf16.mxu0 %v4632_v57  ;;  %v3707_v57 = vld [vmem:[#allocation13 + $0xe8] sm:$0xff] }
 0xd4f   :  { %v4948_v10 = vpop.f32.mrb[36].mxu1  ;;  %v4970_v11 = vpop.f32.mrb[40].mxu0 }
 0xd50   :  { %v4949_v47 = vpop.f32.mrb[37].mxu1  ;;  %v4971_v59 = vpop.f32.mrb[41].mxu0 }
 0xd51   :  { %v4950_v13 = vadd.f32 %v4949_v47, %v4948_v10  ;;  %v4972_v14 = vadd.f32 %v4971_v59, %v4970_v11  ;;  %v4951_v15 = vpop.f32.mrb[38].mxu1  ;;  %v4973_v16 = vpop.f32.mrb[42].mxu0  ;;  %v4644_v10 = vcombine.high %v3694_v7, %v3702_v8  ;;  %v3704_v11 = vld [vmem:[#allocation13 + $0xd0] sm:$0xff]  ;;  %v3679_v59 = vld [vmem:[#allocation13 + $0x8] sm:$0xff] }
 0xd52   :  { %v4952_v17 = vpop.f32.mrb[39].mxu1  ;;  %v4974_v18 = vpop.f32.mrb[43].mxu0  ;;  %v4647_v47 = vcombine.low %v3696_v9, %v3704_v11 }
 0xd53   :  { %v3419_v51 = vadd.f32 %v4950_v13, %v3191_v12  ;;  %v4643_v12 = vcombine.low %v3694_v7, %v3702_v8  ;;  %v3687_v13 = vld [vmem:[#allocation13 + $0x48] sm:$0xff]  ;;  %v3690_v17 = vld [vmem:[#allocation13 + $0x60] sm:$0xff] }
 0xd54   :  { %v4629_v15 = vcombine.low %v3679_v59, %v3687_v13  ;;  %v4630_v16 = vcombine.high %v3679_v59, %v3687_v13 }
 0xd55   :  { %v3459_v19 = vadd.f32 %v4972_v14, %v3419_v51  ;;  %v3682_v14 = vld [vmem:[#allocation13 + $0x20] sm:$0xff] }
 0xd56   :  { %v4635_v18 = vcombine.low %v3682_v14, %v3690_v17  ;;  %v4636_v51 = vcombine.high %v3682_v14, %v3690_v17 }
 0xd57   :  { %v3464_v20 = vadd.f32 %v3459_v19, %v6146_v5  ;;  %v5472_v5 = vld [vmem:[%s6284_s7 + $0x10] sm:$0xff]   ;;  %v3608_v19 = vrot.slane %v6217_v60, %v6106_v6 }
 0xd58   :  { %5095 = vmatpush3.bf16.msra.mxu1 %v5472_v5  ;;  %v3706_v5 = vld [vmem:[#allocation13 + $0xe0] sm:$0xff] }
 0xd59   :  { %3465 = vadd.xlane.f32.xlu0 %v3464_v20  ;;  %5096 = vmatprep.subr.bf16.mxu1 %v5771_v33 }
 0xd5c   :  { %5097 = vmatpush3.bf16.msra.mxu1 %v5473_v27 }
 0xd5d   :  { %5098 = vmatprep.subr.bf16.mxu1 %v5771_v33 }
 0xd60   :  { %5099 = vmatpush3.bf16.msra.mxu1 %v5474_v28 }
 0xd61   :  { %5100 = vmatprep.subr.bf16.mxu1 %v5771_v33 }
 0xd64   :  { %5101 = vmatpush3.bf16.msra.mxu1 %v5475_v2 }
 0xd65   :  { %5102 = vmatprep.subr.bf16.mxu1 %v5771_v33 }
 0xd68   :  { %5103 = vmatpush3.bf16.msra.mxu1 %v5476_v29 }
 0xd69   :  { %5104 = vmatprep.subr.bf16.mxu1 %v5771_v33  ;;  %v3506_v33 = vrot.slane %v6217_v60, %v6094_v34  ;;  %v4648_v34 = vcombine.high %v3696_v9, %v3704_v11  ;;  %v180_v11 = vld [vmem:[#allocation14 + $0x8] sm:$0xff] }
 0xd6a   :  { %v3718_v59 = vrot.slane %v180_v11, %v6079_v58  ;;  %v190_v11 = vld [vmem:[#allocation14 + $0x58] sm:$0xff] }
 0xd6c   :  { %5105 = vmatpush3.bf16.msra.mxu1 %v5477_v30 }
 0xd6d   :  { %3939 = vmatprep.subr.bf16.mxu1 %v4628_v54 }
 0xde6   :  { %v3466_v23 = vpop.xlane.xlu0 %3465 }
 0xde7   :  { %v3467_v24 = vmul.f32 0.0078125, %v3466_v23  ;;  %v3695_v23 = vld [vmem:[#allocation13 + $0x88] sm:$0xff] }
 0xde9   :  { %v3468_v25 = vsub.f32 %v3464_v20, %v3467_v24 }
 0xdeb   :  { %v3469_v26 = vmul.f32 %v3468_v25, %v3468_v25 }
 0xded   :  { %3470 = vadd.xlane.f32.xlu1 %v3469_v26  ;;  %v3698_v26 = vld [vmem:[#allocation13 + $0xa0] sm:$0xff] }
 0xdee   :  { %v4652_v30 = vcombine.high %v3698_v26, %v3706_v5 }
 0xe7a   :  { %v3471_v35 = vpop.xlane.xlu1 %3470 }
 0xe7b   :  { %v3472_v36 = vmul.f32 0.0078125, %v3471_v35  ;;  %v3684_v35 = vld [vmem:[#allocation13 + $0x30] sm:$0xff] }
 0xe7d   :  { %v3473_v37 = vadd.f32 1e-05, %v3472_v36  ;;  %v3692_v36 = vld [vmem:[#allocation13 + $0x70] sm:$0xff] }
 0xe7e   :  { %v4639_v50 = vcombine.low %v3684_v35, %v3692_v36 }
 0xe7f   :  { %5488 = vrsqrt.f32 %v3473_v37  ;;  %v4651_v37 = vcombine.low %v3698_v26, %v3706_v5  ;;  %v188_v26 = vld [vmem:[#allocation14 + $0x48] sm:$0xff] }
 0xe89   :  { %v5489_v39 = vpop.eup %5488 }
 0xe8a   :  { %v3475_v40 = vmul.f32 %v5489_v39, %v3468_v25  ;;  %v3703_v25 = vld [vmem:[#allocation13 + $0xc8] sm:$0xff]  ;;  %v4640_v39 = vcombine.high %v3684_v35, %v3692_v36 }
 0xe8b   :  { %v4646_v29 = vcombine.high %v3695_v23, %v3703_v25  ;;  %v4645_v6 = vcombine.low %v3695_v23, %v3703_v25  ;;  %v187_v23 = vld [vmem:[#allocation14 + $0x40] sm:$0xff]  ;;  %v182_v25 = vld [vmem:[#allocation14 + $0x18] sm:$0xff] }
 0xe8c   :  { %v3480_v42 = vmul.f32 %v3479_v38, %v3475_v40  ;;  %v4634_v38 = vcombine.high %v3681_v31, %v3689_v32  ;;  %v3697_v40 = vld [vmem:[#allocation13 + $0x98] sm:$0xff] }
 0xe8e   :  { %v3485_v43 = vadd.f32 %v3484_v41, %v3480_v42  ;;  %v3705_v41 = vld [vmem:[#allocation13 + $0xd8] sm:$0xff]  ;;  %v3700_v42 = vld [vmem:[#allocation13 + $0xb0] sm:$0xff] }
 0xe8f   :  { %v4650_v44 = vcombine.high %v3697_v40, %v3705_v41 }
 0xe90   :  { %v3502_v49 = vpack.c.bf16 %v3485_v43, %v3485_v43  ;;  %v3708_v43 = vld [vmem:[#allocation13 + $0xf0] sm:$0xff] }
 0xe91   :  { %v4656_v45 = vcombine.high %v3700_v42, %v3708_v43  ;;  %v4655_v54 = vcombine.low %v3700_v42, %v3708_v43 }
 0xe92   :  { %5107 = vmatmul.mubr.bf16.vlgmr.msra.gmra.mrb[40].mxu1 %v3502_v49  ;;  %v4633_v49 = vcombine.low %v3681_v31, %v3689_v32 }
 0xe93   :  { %3971 = vmatprep.mubr.bf16.mxu1 %v5773_v52  ;;  %3940 = vmatpush1.bf16.msra.mxu1 %v4627_v53  ;;  %v4649_v53 = vcombine.low %v3697_v40, %v3705_v41  ;;  %v185_v40 = vld [vmem:[#allocation14 + $0x30] sm:$0xff]  ;;  %v191_v41 = vld [vmem:[#allocation14 + $0x60] sm:$0xff] }
 0xe94   :  { %3941 = vmatprep.subr.bf16.mxu1 %v4644_v10  ;;  %v183_v10 = vld [vmem:[#allocation14 + $0x20] sm:$0xff] }
 0xe97   :  { %3942 = vmatpush1.bf16.msra.mxu1 %v4643_v12  ;;  %v184_v12 = vld [vmem:[#allocation14 + $0x28] sm:$0xff] }
 0xe98   :  { %3980 = vmatprep.subr.bf16.mxu1 %v4630_v16  ;;  %v3734_v13 = vrot.slane %v184_v12, %v6079_v58 }
 0xf65   :  { %v3589_v63 = vpop.f32.mrb[40].mxu1 }
 0xf66   :  { %v3590_v0 = vadd.f32 %v3589_v63, %v3506_v33  ;;  %v5108_v1 = vpop.f32.mrb[41].mxu1  ;;  %v4637_v33 = vcombine.low %v3683_v46, %v3691_v62  ;;  %v3762_v46 = vrot.slane %v191_v41, %v6079_v58 }
 0xf67   :  { %v3592_v48 = vpop.f32.mrb[42].mxu1  ;;  %v3693_v1 = vld [vmem:[#allocation13 + $0x78] sm:$0xff] }
 0xf68   :  { %v3595_v3 = vmax.f32 %v3590_v0, 0.0  ;;  %v5109_v4 = vpop.f32.mrb[43].mxu1  ;;  %v3685_v0 = vld [vmem:[#allocation13 + $0x38] sm:$0xff] }
 0xf69   :  { %v3701_v4 = vld [vmem:[#allocation13 + $0xb8] sm:$0xff]  ;;  %v4641_v7 = vcombine.low %v3685_v0, %v3693_v1 }
 0xf6a   :  { %v3604_v61 = vpack.c.bf16 %v3595_v3, %v3595_v3  ;;  %v4642_v3 = vcombine.high %v3685_v0, %v3693_v1 }
 0xf6c   :  { %5119 = vmatmul.mubr.msk.bf16.vlgmr.msra.gmra.mrb[44].mxu0 %vm3633_vm1, %v3604_v61  ;;  %v3709_v61 = vld [vmem:[#allocation13 + $0xf8] sm:$0xff] }
 0xf6d   :  { %4022 = vmatpush1.bf16.msra.mxu0 %v4631_v56  ;;  %4053 = vmatprep.mubr.bf16.mxu0 %v5773_v52  ;;  %v3699_v56 = vld [vmem:[#allocation13 + $0xa8] sm:$0xff]  ;;  %v4658_v8 = vcombine.high %v3701_v4, %v3709_v61  ;;  %v4657_v9 = vcombine.low %v3701_v4, %v3709_v61 }
 0xf6e   :  { %4023 = vmatprep.subr.bf16.mxu0 %v4648_v34  ;;  %v4654_v63 = vcombine.high %v3699_v56, %v3707_v57  ;;  %v4653_v48 = vcombine.low %v3699_v56, %v3707_v57  ;;  %v3730_v34 = vrot.slane %v183_v10, %v6079_v58 }
 0xf71   :  { %4024 = vmatpush1.bf16.msra.mxu0 %v4647_v47  ;;  %v3714_v47 = vrot.slane %v6217_v60, %v6079_v58 }
 0xf72   :  { %4103 = vmatprep.subr.bf16.mxu0 %v4636_v51 }
0x103f   :  { %v3671_v20 = vpop.f32.mrb[44].mxu0 }
0x1040   :  { %v3672_v21 = vadd.f32 %v3671_v20, %v3608_v19  ;;  %v5120_v22 = vpop.f32.mrb[45].mxu0 }
0x1041   :  { %v3674_v24 = vpop.f32.mrb[46].mxu0  ;;  %v181_v22 = vld [vmem:[#allocation14 + $0x10] sm:$0xff] }
0x1042   :  { %v3677_v27 = vmax.f32 %v3672_v21, 0.0  ;;  %v5121_v28 = vpop.f32.mrb[47].mxu0  ;;  %v3722_v5 = vrot.slane %v181_v22, %v6079_v58 }
0x1043   :  { %v3726_v28 = vrot.slane %v182_v25, %v6079_v58 }
0x1044   :  { %v6224_v2 = vpack.c.bf16 %v3677_v27, %v3677_v27  ;;  %v3746_v27 = vrot.slane %v187_v23, %v6079_v58 }
0x1046   :  { %4659 = vmatmul.mubr.msk.bf16.vlgmr.msra.gmra.mrb[44].mxu1 %vm3935_vm2, %v6224_v2  ;;  %4661 = vmatmul.mubr.msk.bf16.vlgmr.msra.gmra.mrb[48].mxu0 %vm3935_vm2, %v6224_v2 }
0x1047   :  { %3981 = vmatpush1.bf16.msra.mxu1 %v4629_v15  ;;  %4104 = vmatpush1.bf16.msra.mxu0 %v4635_v18 }
0x1048   :  { %3982 = vmatprep.subr.bf16.mxu1 %v4646_v29  ;;  %4105 = vmatprep.subr.bf16.mxu0 %v4652_v30 }
0x1049   :  { %4012 = vmatprep.mubr.bf16.mxu1 %v5773_v52  ;;  %4135 = vmatprep.mubr.bf16.mxu0 %v5773_v52 }
0x104b   :  { %3983 = vmatpush1.bf16.msra.mxu1 %v4645_v6  ;;  %4106 = vmatpush1.bf16.msra.mxu0 %v4651_v37 }
0x104c   :  { %4062 = vmatprep.subr.bf16.mxu1 %v4634_v38  ;;  %4185 = vmatprep.subr.bf16.mxu0 %v4640_v39 }
0x104e   :  { %4660 = vmatmul.mubr.msk.bf16.vlgmr.msra.gmra.mrb[48].mxu1 %vm3935_vm2, %v6224_v2  ;;  %4663 = vmatmul.mubr.msk.bf16.vlgmr.msra.gmra.mrb[52].mxu0 %vm3935_vm2, %v6224_v2 }
0x104f   :  { %4063 = vmatpush1.bf16.msra.mxu1 %v4633_v49  ;;  %4186 = vmatpush1.bf16.msra.mxu0 %v4639_v50  ;;  %v186_v49 = vld [vmem:[#allocation14 + $0x38] sm:$0xff]  ;;  %v192_v50 = vld [vmem:[#allocation14 + $0x68] sm:$0xff] }
0x1050   :  { %4064 = vmatprep.subr.bf16.mxu1 %v4650_v44  ;;  %4187 = vmatprep.subr.bf16.mxu0 %v4656_v45  ;;  %v3738_v45 = vrot.slane %v185_v40, %v6079_v58 }
0x1051   :  { %4094 = vmatprep.mubr.bf16.mxu1 %v5773_v52  ;;  %4217 = vmatprep.mubr.bf16.mxu0 %v5773_v52 }
0x1053   :  { %4065 = vmatpush1.bf16.msra.mxu1 %v4649_v53  ;;  %4188 = vmatpush1.bf16.msra.mxu0 %v4655_v54  ;;  %v3742_v53 = vrot.slane %v186_v49, %v6079_v58  ;;  %v3766_v54 = vrot.slane %v192_v50, %v6079_v58 }
0x1054   :  { %4144 = vmatprep.subr.bf16.mxu1 %v4638_v55 }
0x1056   :  { %4662 = vmatmul.mubr.msk.bf16.vlgmr.msra.gmra.mrb[52].mxu1 %vm3935_vm2, %v6224_v2  ;;  %4665 = vmatmul.mubr.msk.bf16.vlgmr.msra.gmra.mrb[56].mxu0 %vm3935_vm2, %v6224_v2 }
0x1057   :  { %4145 = vmatpush1.bf16.msra.mxu1 %v4637_v33  ;;  %4176 = vmatprep.mubr.bf16.mxu1 %v5773_v52 }
0x1058   :  { %4146 = vmatprep.subr.bf16.mxu1 %v4654_v63 }
0x105b   :  { %4147 = vmatpush1.bf16.msra.mxu1 %v4653_v48 }
0x105c   :  { %4226 = vmatprep.subr.bf16.mxu1 %v4642_v3 }
0x105e   :  { %4664 = vmatmul.mubr.msk.bf16.vlgmr.msra.gmra.mrb[56].mxu1 %vm3935_vm2, %v6224_v2 }
0x105f   :  { %4227 = vmatpush1.bf16.msra.mxu1 %v4641_v7  ;;  %4258 = vmatprep.mubr.bf16.mxu1 %v5773_v52 }
0x1060   :  { %4228 = vmatprep.subr.bf16.mxu1 %v4658_v8  ;;  %v189_v8 = vld [vmem:[#allocation14 + $0x50] sm:$0xff] }
0x1063   :  { %4229 = vmatpush1.bf16.msra.mxu1 %v4657_v9 }
0x1066   :  { %4666 = vmatmul.mubr.msk.bf16.vlgmr.msra.gmra.mrb[60].mxu1 %vm3935_vm2, %v6224_v2  ;;  %v3750_v2 = vrot.slane %v188_v26, %v6079_v58 }
0x1119   :  { %v3973_v14 = vpop.f32.mrb[44].mxu1  ;;  %v4055_v15 = vpop.f32.mrb[48].mxu0 }
0x111a   :  { %v3974_v52 = vadd.f32 %v3973_v14, %v3714_v47  ;;  %v4056_v16 = vadd.f32 %v4055_v15, %v3730_v34  ;;  %v3975_v17 = vpop.f32.mrb[45].mxu1  ;;  %v4057_v18 = vpop.f32.mrb[49].mxu0  ;;  %v3754_v47 = vrot.slane %v189_v8, %v6079_v58 }
0x111b   :  { %v3976_v51 = vadd.f32 %v3975_v17, %v3718_v59  ;;  %v4058_v19 = vadd.f32 %v4057_v18, %v3734_v13  ;;  %v3977_v20 = vpop.f32.mrb[46].mxu1  ;;  %v4059_v21 = vpop.f32.mrb[50].mxu0  ;;  %v3758_v59 = vrot.slane %v190_v11, %v6079_v58 }
0x111c   :  { %5490 = vtanh.f32 %v3974_v52  ;;  %v3978_v60 = vpop.f32.mrb[47].mxu1  ;;  %v4060_v24 = vpop.f32.mrb[51].mxu0  ;;  %v194_v20 = vld [vmem:[#allocation14 + $0x78] sm:$0xff] }
0x111d   :  { %5492 = vtanh.f32 %v4056_v16  ;;  %v3774_v60 = vrot.slane %v194_v20, %v6079_v58 }
0x111e   :  { %5494 = vtanh.f32 %v3976_v51  ;;  %v193_v51 = vld [vmem:[#allocation14 + $0x70] sm:$0xff] }
0x111f   :  { %5496 = vtanh.f32 %v4058_v19  ;;  %v3770_v22 = vrot.slane %v193_v51, %v6079_v58 }
0x1121   :  { %v4014_v29 = vpop.f32.mrb[48].mxu1  ;;  %v4137_v30 = vpop.f32.mrb[52].mxu0 }
0x1122   :  { %v4015_v31 = vadd.f32 %v4014_v29, %v3722_v5  ;;  %v4138_v32 = vadd.f32 %v4137_v30, %v3746_v27  ;;  %v4016_v35 = vpop.f32.mrb[49].mxu1  ;;  %v4139_v36 = vpop.f32.mrb[53].mxu0 }
0x1123   :  { %v4017_v6 = vadd.f32 %v4016_v35, %v3726_v28  ;;  %v4140_v37 = vadd.f32 %v4139_v36, %v3750_v2  ;;  %v4018_v38 = vpop.f32.mrb[50].mxu1  ;;  %v4141_v39 = vpop.f32.mrb[54].mxu0 }
0x1124   :  { %5498 = vtanh.f32 %v4015_v31  ;;  %v4019_v42 = vpop.f32.mrb[51].mxu1  ;;  %v4142_v43 = vpop.f32.mrb[55].mxu0 }
0x1125   :  { %5500 = vtanh.f32 %v4138_v32 }
0x1126   :  { %v5491_v44 = vpop.eup %5490  ;;  %5502 = vtanh.f32 %v4017_v6 }
0x1127   :  { %v5493_v62 = vpop.eup %5492  ;;  %4283 = vst [vmem:[#allocation17] sm:$0xff] %v5491_v44  ;;  %5504 = vtanh.f32 %v4140_v37 }
0x1128   :  { %v5495_v55 = vpop.eup %5494  ;;  %4287 = vst [vmem:[#allocation17 + $0x20] sm:$0xff] %v5493_v62 }
0x1129   :  { %v5497_v56 = vpop.eup %5496  ;;  %4284 = vst [vmem:[#allocation17 + $0x8] sm:$0xff] %v5495_v55  ;;  %v4096_v57 = vpop.f32.mrb[52].mxu1 }
0x112a   :  { %v4219_v33 = vpop.f32.mrb[56].mxu0  ;;  %4288 = vst [vmem:[#allocation17 + $0x28] sm:$0xff] %v5497_v56  ;;  %v4097_v63 = vadd.f32 %v4096_v57, %v3738_v45  ;;  %v4098_v1 = vpop.f32.mrb[53].mxu1 }
0x112b   :  { %v4220_v0 = vadd.f32 %v4219_v33, %v3762_v46  ;;  %v4221_v48 = vpop.f32.mrb[57].mxu0  ;;  %v4099_v3 = vadd.f32 %v4098_v1, %v3742_v53  ;;  %v4100_v61 = vpop.f32.mrb[54].mxu1 }
0x112c   :  { %v4222_v4 = vadd.f32 %v4221_v48, %v3766_v54  ;;  %v4223_v7 = vpop.f32.mrb[58].mxu0  ;;  %5506 = vtanh.f32 %v4097_v63  ;;  %v4101_v9 = vpop.f32.mrb[55].mxu1 }
0x112d   :  { %v4224_v10 = vpop.f32.mrb[59].mxu0  ;;  %5508 = vtanh.f32 %v4220_v0 }
0x112e   :  { %v5499_v12 = vpop.eup %5498  ;;  %5510 = vtanh.f32 %v4099_v3 }
0x112f   :  { %v5501_v34 = vpop.eup %5500  ;;  %4285 = vst [vmem:[#allocation17 + $0x10] sm:$0xff] %v5499_v12  ;;  %5512 = vtanh.f32 %v4222_v4 }
0x1130   :  { %v5503_v13 = vpop.eup %5502  ;;  %4291 = vst [vmem:[#allocation17 + $0x40] sm:$0xff] %v5501_v34 }
0x1131   :  { %v5505_v14 = vpop.eup %5504  ;;  %4286 = vst [vmem:[#allocation17 + $0x18] sm:$0xff] %v5503_v13  ;;  %v4178_v15 = vpop.f32.mrb[56].mxu1 }
0x1132   :  { %4292 = vst [vmem:[#allocation17 + $0x48] sm:$0xff] %v5505_v14  ;;  %v4179_v52 = vadd.f32 %v4178_v15, %v3754_v47  ;;  %v4180_v16 = vpop.f32.mrb[57].mxu1 }
0x1133   :  { %v4181_v17 = vadd.f32 %v4180_v16, %v3758_v59  ;;  %v4182_v18 = vpop.f32.mrb[58].mxu1 }
0x1134   :  { %5514 = vtanh.f32 %v4179_v52  ;;  %v4183_v19 = vpop.f32.mrb[59].mxu1 }
0x1135   :  { %5516 = vtanh.f32 %v4181_v17 }
0x1136   :  { %v5507_v21 = vpop.eup %5506 }
0x1137   :  { %v5509_v23 = vpop.eup %5508  ;;  %4289 = vst [vmem:[#allocation17 + $0x30] sm:$0xff] %v5507_v21 }
0x1138   :  { %v5511_v24 = vpop.eup %5510  ;;  %4295 = vst [vmem:[#allocation17 + $0x60] sm:$0xff] %v5509_v23 }
0x1139   :  { %v5513_v25 = vpop.eup %5512  ;;  %4290 = vst [vmem:[#allocation17 + $0x38] sm:$0xff] %v5511_v24  ;;  %v4260_v26 = vpop.f32.mrb[60].mxu1 }
0x113a   :  { %4296 = vst [vmem:[#allocation17 + $0x68] sm:$0xff] %v5513_v25  ;;  %v4261_v5 = vadd.f32 %v4260_v26, %v3770_v22  ;;  %v4262_v27 = vpop.f32.mrb[61].mxu1 }
0x113b   :  { %v4263_v28 = vadd.f32 %v4262_v27, %v3774_v60  ;;  %v4264_v2 = vpop.f32.mrb[62].mxu1 }
0x113c   :  { %5518 = vtanh.f32 %v4261_v5  ;;  %v4265_v29 = vpop.f32.mrb[63].mxu1 }
0x113d   :  { %5520 = vtanh.f32 %v4263_v28 }
0x113e   :  { %v5515_v30 = vpop.eup %5514 }
0x113f   :  { %v5517_v31 = vpop.eup %5516  ;;  %4293 = vst [vmem:[#allocation17 + $0x50] sm:$0xff] %v5515_v30 }
0x1140   :  { %4294 = vst [vmem:[#allocation17 + $0x58] sm:$0xff] %v5517_v31 }
0x1146   :  { %v5519_v58 = vpop.eup %5518 }
0x1147   :  { %v5521_v32 = vpop.eup %5520  ;;  %4297 = vst [vmem:[#allocation17 + $0x70] sm:$0xff] %v5519_v58 }
0x1148   :  { %4298 = vst [vmem:[#allocation17 + $0x78] sm:$0xff] %v5521_v32 }
0x1149   :  { %5732 = shalt.err (!%p5729_p6)
}
0x114a   :  { %s5733_s30 = scalar_lea.hbm %s6289_s12, 2048 }
0x114b   :  { %p5734_p7 = scmp.ne.s32.totalorder %s6289_s12, %s5733_s30  ;;  %p5737_p8 = scmp.lt.u32.totalorder %s5733_s30, %s6289_s12 }
0x114d   :  { %p5739_p9 = pnand %p5737_p8, %p5734_p7 }
0x114f   :  { %5742 = shalt.err (!%p5739_p9)
}
0x1150   :  { %4308 = dma.vmem_to_hbm [thread:$0]  %s4306_s11, 2048, %s6289_s12, [#allocation4]  }
0x1151   :  { %5753 = dma.done.wait [#allocation4], 2048  }
0x1152   :  { %5754 = vsyncadd [#allocation4], 4294965248 }
0x1153   :  { %4312 = vsyncpa [#allocation3], 1 }
0x1154   :  { %4313 = vsyncpa [#allocation6], 1 }
0x1155   :  { %4314 = vsyncpa [#allocation9], 1 }
0x1156   :  { %4315 = vsyncpa [#allocation12], 1 }
0x1157   :  { %4316 = vsyncpa [#allocation15], 1 }
0x1158   :  { %4317 = vsyncpa [#allocation4], 1 }

</bundles_post_ra>
